<compile_context>
chip_gen: v6e
topology: v6e:2x2x1
jax: 0.10.0
libtpu: 0.0.40
codegen_flags: <defaults>
</compile_context>

<pallas_src>
import functools

import jax
import jax.numpy as jnp
from jax import lax
from jax.experimental import pallas as pl
from jax.experimental.pallas import tpu as pltpu


def _round_up(x, m):
    return (x + m - 1) // m * m


def _pad_gate_weight(w, H, Hp, in_pad):
    """(4H, in_dim) PyTorch weight -> (in_pad, 4*Hp) transposed, gate-major.

    Each gate's H output columns are padded to Hp so every gate slice starts on
    a 128-lane boundary.  All padding is zeros (padded h/c channels stay 0).
    """
    in_dim = w.shape[1]
    w4 = w.reshape(4, H, in_dim)                                # gates i, f, g, o
    w4 = jnp.pad(w4, ((0, 0), (0, Hp - H), (0, 0)))             # (4, Hp, in_dim)
    wt = jnp.transpose(w4, (2, 0, 1)).reshape(in_dim, 4 * Hp)   # (in_dim, 4Hp)
    if in_pad > in_dim:
        wt = jnp.pad(wt, ((0, in_pad - in_dim), (0, 0)))
    return wt.astype(jnp.float32)


def _pad_gate_bias(b, H, Hp):
    """(4H,) combined bias -> (1, 4*Hp) gate-major padded."""
    b4 = jnp.pad(b.reshape(4, H), ((0, 0), (0, Hp - H)))
    return b4.reshape(1, 4 * Hp).astype(jnp.float32)


def _encoder_lstm_kernel(x_ref, wih_ref, whh_ref, bias_ref,
                         out_ref, hN_ref, cN_ref,
                         act_sc, gx_sc, h_sc, c_sc,
                         *, n_layers, t_real, dp, unroll, matmul_dtype):
    """Fused multi-layer LSTM.  grid = (n_layers, n_time_chunks), both 'arbitrary'.

    x_ref    : (T_CHUNK*Bp, Dp)   embedded input rows of this chunk (matmul_dtype)
    wih_ref  : (1, Din, 4Hp)      input->gate weights of this layer (matmul_dtype)
    whh_ref  : (1, Hp, 4Hp)       hidden->gate weights of this layer (matmul_dtype)
    bias_ref : (1, 1, 4Hp)        combined bias of this layer (f32)
    out_ref  : (T_CHUNK*Bp, Hp)   per-timestep hidden outputs (written by last layer only)
    hN_ref   : (1, Bp, Hp)        final hidden state of this layer (captured at t == T-1)
    cN_ref   : (1, Bp, Hp)        final cell state of this layer
    act_sc   : (Tp*Bp, Hp)        VMEM-resident activations of the current layer (f32)
    gx_sc    : (T_CHUNK*Bp, 4Hp)  input-projection gates for the current chunk (f32)
    h_sc/c_sc: (Bp, Hp)           recurrent carry across time chunks (f32)
    """
    l = pl.program_id(0)              # layer index      (sequential)
    s = pl.program_id(1)              # time-chunk index (sequential)

    Bp, Hp = h_sc.shape
    rows = gx_sc.shape[0]
    t_chunk = rows // Bp
    r0 = pl.multiple_of(s * rows, 8)  # row offset of this chunk in act_sc

    # Reset the recurrent state at the start of each layer.
    @pl.when(s == 0)
    def _():
        h_sc[...] = jnp.zeros_like(h_sc)
        c_sc[...] = jnp.zeros_like(c_sc)

    bias = bias_ref[0]                # (1, 4Hp) f32

    # ---- input projection for the whole chunk: ONE batched MXU matmul ----
    @pl.when(l == 0)
    def _():
        gx_sc[...] = (jnp.dot(x_ref[...], wih_ref[0, :dp, :],
                              preferred_element_type=jnp.float32) + bias)

    @pl.when(l > 0)
    def _():
        prev = act_sc[pl.ds(r0, rows)].astype(matmul_dtype)   # previous layer, VMEM-resident
        gx_sc[...] = (jnp.dot(prev, wih_ref[0, :Hp, :],
                              preferred_element_type=jnp.float32) + bias)

    whh = whh_ref[0]                                          # (Hp, 4Hp), hoisted
    is_last_layer = l == n_layers - 1

    # ---- recurrence over the chunk; carry stays in vregs ----
    def step(t, carry):
        h_prev, c_prev = carry
        row = pl.multiple_of(t * Bp, 8)
        gates = gx_sc[pl.ds(row, Bp)] + jnp.dot(
            h_prev.astype(matmul_dtype), whh,
            preferred_element_type=jnp.float32)               # (Bp, 4Hp)
        # Gate slices are 128-lane aligned (gate-major layout, Hp % 128 == 0).
        i_g = jax.nn.sigmoid(gates[:, 0 * Hp:1 * Hp])
        f_g = jax.nn.sigmoid(gates[:, 1 * Hp:2 * Hp])
        g_g = jnp.tanh(gates[:, 2 * Hp:3 * Hp])
        o_g = jax.nn.sigmoid(gates[:, 3 * Hp:4 * Hp])
        c_new = f_g * c_prev + i_g * g_g
        h_new = o_g * jnp.tanh(c_new)

        act_sc[pl.ds(pl.multiple_of(r0 + row, 8), Bp)] = h_new    # next layer's input

        @pl.when(is_last_layer)
        def _():
            out_ref[pl.ds(row, Bp)] = h_new.astype(out_ref.dtype)

        # Capture the final state exactly at global step T-1 (time may be padded).
        @pl.when(s * t_chunk + t == t_real - 1)
        def _():
            hN_ref[0] = h_new.astype(hN_ref.dtype)
            cN_ref[0] = c_new.astype(cN_ref.dtype)

        return h_new, c_new

    h, c = lax.fori_loop(0, t_chunk, step, (h_sc[...], c_sc[...]), unroll=unroll)
    h_sc[...] = h
    c_sc[...] = c


class EncoderParams:
    """Deterministically initialized parameters matching the PyTorch module."""

    def __init__(self, key, input_dim, emb_dim, hidden_dim, n_layers, pad_idx):
        self.input_dim = input_dim
        self.emb_dim = emb_dim
        self.hidden_dim = hidden_dim
        self.n_layers = n_layers
        self.pad_idx = pad_idx

        keys = jax.random.split(key, 1 + 4 * n_layers)
        # Embedding ~ N(0,1), padding_idx row zeroed (like nn.Embedding).
        emb = jax.random.normal(keys[0], (input_dim, emb_dim), jnp.float32)
        self.embedding = emb.at[pad_idx].set(0.0)

        bound = 1.0 / jnp.sqrt(hidden_dim)
        self.layers = []
        for layer in range(n_layers):
            in_dim = emb_dim if layer == 0 else hidden_dim
            k0, k1, k2, k3 = keys[1 + 4 * layer:1 + 4 * (layer + 1)]
            w_ih = jax.random.uniform(k0, (4 * hidden_dim, in_dim),
                                      jnp.float32, -bound, bound)
            w_hh = jax.random.uniform(k1, (4 * hidden_dim, hidden_dim),
                                      jnp.float32, -bound, bound)
            b_ih = jax.random.uniform(k2, (4 * hidden_dim,),
                                      jnp.float32, -bound, bound)
            b_hh = jax.random.uniform(k3, (4 * hidden_dim,),
                                      jnp.float32, -bound, bound)
            self.layers.append((w_ih, w_hh, b_ih, b_hh))


def encoder_forward(params: EncoderParams, src, *,
                    matmul_dtype=jnp.float32, time_chunk=None):
    """src: (B, T) int32 token ids -> (outputs (B,T,H), (h_n, c_n)).

    matmul_dtype=jnp.bfloat16 is recommended on v5e/v6e/v7x for ~2x MXU
    throughput and half the weight/input HBM traffic (expect ~1e-2 deviation
    from the f32 reference); float32 (default) is bit-faithful to the reference.
    """
    B, T = src.shape
    E = params.emb_dim
    H = params.hidden_dim
    L = params.n_layers

    Bp = _round_up(max(B, 8), 8)            # sublane-dense batch
    Hp = _round_up(max(H, 128), 128)        # lane-dense hidden / gate slices
    Dp = _round_up(max(E, 1), 128)          # lane-dense embedded input
    Din = max(Dp, Hp)                       # uniform in-dim for stacked W_ih

    # Chunk size: target ~256 LHS rows for the chunk projection (full MXU on
    # v6e/v7x; v5e's 128-row MXU is also saturated).  Time is padded up to a
    # multiple of the chunk, so any T / any user time_chunk is handled exactly.
    if time_chunk is not None:
        t_chunk = max(1, min(int(time_chunk), T))
    else:
        t_chunk = max(1, min(256 // Bp, 32, T))
    Tp = _round_up(T, t_chunk)
    n_chunks = Tp // t_chunk
    rows = t_chunk * Bp

    # --- embedding + dropout(identity, eval) + layout padding (XLA glue) ---
    embedded = jnp.take(params.embedding, src, axis=0)              # (B, T, E)
    x = jnp.transpose(embedded, (1, 0, 2)).astype(jnp.float32)      # (T, B, E)
    x = jnp.pad(x, ((0, Tp - T), (0, Bp - B), (0, Dp - E)))         # (Tp, Bp, Dp)
    x2 = x.reshape(Tp * Bp, Dp).astype(matmul_dtype)                # row-major rows

    # --- per-layer weights (gate-major, padded, pre-cast to matmul_dtype) ---
    wih_list, whh_list, bias_list = [], [], []
    for (w_ih, w_hh, b_ih, b_hh) in params.layers:
        wih_list.append(_pad_gate_weight(w_ih, H, Hp, in_pad=Din))
        whh_list.append(_pad_gate_weight(w_hh, H, Hp, in_pad=Hp))
        bias_list.append(_pad_gate_bias(b_ih + b_hh, H, Hp))
    wih_all = jnp.stack(wih_list).astype(matmul_dtype)      # (L, Din, 4Hp)
    whh_all = jnp.stack(whh_list).astype(matmul_dtype)      # (L, Hp, 4Hp)
    bias_all = jnp.stack(bias_list)                         # (L, 1, 4Hp) f32

    unroll = True if Hp <= 256 else 8       # bound live vregs for large Hp

    kernel = functools.partial(
        _encoder_lstm_kernel,
        n_layers=L, t_real=T, dp=Dp, unroll=unroll, matmul_dtype=matmul_dtype)

    # VMEM budget derived from actual buffer sizes (not a fixed 32 MiB).
    msz = jnp.dtype(matmul_dtype).itemsize
    vmem_need = (
        Tp * Bp * Hp * 4              # act_sc
        + rows * 4 * Hp * 4           # gx_sc
        + 2 * Bp * Hp * 4             # h/c carry
        + 2 * rows * Dp * msz         # x blocks (double-buffered)
        + 2 * Din * 4 * Hp * msz      # W_ih blocks
        + 2 * Hp * 4 * Hp * msz       # W_hh blocks
        + 2 * 8 * 4 * Hp * 4          # bias blocks (sublane-padded)
        + 2 * rows * Hp * 4           # out blocks
        + 4 * Bp * Hp * 4)            # hN / cN blocks
    vmem_limit = int(min(max(2 * vmem_need + (2 << 20), 16 << 20), 100 << 20))

    grid_spec = pltpu.PrefetchScalarGridSpec(
        num_scalar_prefetch=0,
        grid=(L, n_chunks),                                  # layer outer, time inner
        in_specs=[
            # x: streamed only while l == 0 (constant block index afterwards
            # -> Pallas skips the re-fetch for deeper layers).
            pl.BlockSpec((rows, Dp),
                         lambda l, s: (jnp.where(l == 0, s, n_chunks - 1), 0)),
            pl.BlockSpec((1, Din, 4 * Hp), lambda l, s: (l, 0, 0)),      # W_ih
            pl.BlockSpec((1, Hp, 4 * Hp), lambda l, s: (l, 0, 0)),       # W_hh
            pl.BlockSpec((1, 1, 4 * Hp), lambda l, s: (l, 0, 0)),        # bias
        ],
        out_specs=[
            # outputs: block index only advances on the final layer, so HBM
            # writeback happens exactly once per chunk (no L-times flush).
            pl.BlockSpec((rows, Hp),
                         lambda l, s: (jnp.where(l == L - 1, s, 0), 0)),
            pl.BlockSpec((1, Bp, Hp), lambda l, s: (l, 0, 0)),           # h_n
            pl.BlockSpec((1, Bp, Hp), lambda l, s: (l, 0, 0)),           # c_n
        ],
        scratch_shapes=[
            pltpu.VMEM((Tp * Bp, Hp), jnp.float32),          # layer activations
            pltpu.VMEM((rows, 4 * Hp), jnp.float32),         # chunk input gates
            pltpu.VMEM((Bp, Hp), jnp.float32),               # h carry
            pltpu.VMEM((Bp, Hp), jnp.float32),               # c carry
        ],
    )

    out_shapes = (
        jax.ShapeDtypeStruct((Tp * Bp, Hp), jnp.float32),
        jax.ShapeDtypeStruct((L, Bp, Hp), jnp.float32),
        jax.ShapeDtypeStruct((L, Bp, Hp), jnp.float32),
    )

    out_p, hN_p, cN_p = pl.pallas_call(
        kernel,
        out_shape=out_shapes,
        grid_spec=grid_spec,
        compiler_params=pltpu.CompilerParams(
            # Both axes carry a sequential dependency (layer stack, recurrence).
            dimension_semantics=("arbitrary", "arbitrary"),
            vmem_limit_bytes=vmem_limit,
        ),
    )(x2, wih_all, whh_all, bias_all)

    out = out_p.reshape(Tp, Bp, Hp)[:T, :B, :H]              # drop time/batch/feat pad
    outputs = jnp.transpose(out, (1, 0, 2))                  # (B, T, H) batch_first
    h_n = hN_p[:, :B, :H]                                    # (n_layers, B, H)
    c_n = cN_p[:, :B, :H]
    return outputs, (h_n, c_n)


def _reference_forward(params: EncoderParams, src):
    """Pure-JAX reference implementation of the same LSTM for validation."""
    embedded = jnp.take(params.embedding, src, axis=0)
    x = jnp.transpose(embedded, (1, 0, 2)).astype(jnp.float32)  # (T, B, E)
    T, B, _ = x.shape
    H = params.hidden_dim
    h_finals, c_finals = [], []
    for (w_ih, w_hh, b_ih, b_hh) in params.layers:
        h = jnp.zeros((B, H), jnp.float32)
        c = jnp.zeros((B, H), jnp.float32)
        outs = []
        for t in range(T):
            gates = x[t] @ w_ih.T + h @ w_hh.T + b_ih + b_hh
            i = jax.nn.sigmoid(gates[:, 0 * H:1 * H])
            f = jax.nn.sigmoid(gates[:, 1 * H:2 * H])
            g = jnp.tanh(gates[:, 2 * H:3 * H])
            o = jax.nn.sigmoid(gates[:, 3 * H:4 * H])
            c = f * c + i * g
            h = o * jnp.tanh(c)
            outs.append(h)
        x = jnp.stack(outs, axis=0)
        h_finals.append(h)
        c_finals.append(c)
    return (jnp.transpose(x, (1, 0, 2)),
            (jnp.stack(h_finals, 0), jnp.stack(c_finals, 0)))


if __name__ == "__main__":
    # Small shapes consistent with the module's forward.
    INPUT_DIM = 50     # vocab size
    EMB_DIM = 32
    HIDDEN_DIM = 32
    N_LAYERS = 2
    PAD_IDX = 0
    BATCH = 2
    SEQ = 8

    key = jax.random.PRNGKey(0)
    pkey, skey = jax.random.split(key)
    params = EncoderParams(pkey, INPUT_DIM, EMB_DIM, HIDDEN_DIM, N_LAYERS, PAD_IDX)
    src = jax.random.randint(skey, (BATCH, SEQ), 0, INPUT_DIM, dtype=jnp.int32)

    # --- f32 path (strict), with a non-divisor chunk to exercise time padding ---
    outputs, (h_n, c_n) = encoder_forward(params, src, time_chunk=3)
    jax.block_until_ready((outputs, h_n, c_n))
    ref_out, (ref_h, ref_c) = _reference_forward(params, src)
    assert outputs.shape == (BATCH, SEQ, HIDDEN_DIM)
    assert h_n.shape == (N_LAYERS, BATCH, HIDDEN_DIM)
    assert c_n.shape == (N_LAYERS, BATCH, HIDDEN_DIM)
    assert jnp.allclose(outputs, ref_out, atol=1e-4, rtol=1e-4)
    assert jnp.allclose(h_n, ref_h, atol=1e-4, rtol=1e-4)
    assert jnp.allclose(c_n, ref_c, atol=1e-4, rtol=1e-4)

    # --- bf16 MXU path (perf mode), looser tolerance ---
    out_bf, (h_bf, c_bf) = encoder_forward(params, src, matmul_dtype=jnp.bfloat16)
    jax.block_until_ready((out_bf, h_bf, c_bf))
    assert jnp.allclose(out_bf, ref_out, atol=7.5e-2, rtol=0)
    assert jnp.allclose(h_bf, ref_h, atol=7.5e-2, rtol=0)
    assert jnp.allclose(c_bf, ref_c, atol=7.5e-2, rtol=0)

    print("KERNEL_OK")
</pallas_src>

<mosaic_0001>
module attributes {stable_mosaic.version = 11 : i64} {
  func.func @_encoder_lstm_kernel(%arg0: i32, %arg1: i32, %arg2: memref<24x128xf32, #tpu.memory_space<vmem>>, %arg3: memref<1x128x512xf32, #tpu.memory_space<vmem>>, %arg4: memref<1x128x512xf32, #tpu.memory_space<vmem>>, %arg5: memref<1x1x512xf32, #tpu.memory_space<vmem>>, %arg6: memref<24x128xf32, #tpu.memory_space<vmem>>, %arg7: memref<1x8x128xf32, #tpu.memory_space<vmem>>, %arg8: memref<1x8x128xf32, #tpu.memory_space<vmem>>, %arg9: memref<72x128xf32, #tpu.memory_space<vmem>>, %arg10: memref<24x512xf32, #tpu.memory_space<vmem>>, %arg11: memref<8x128xf32, #tpu.memory_space<vmem>>, %arg12: memref<8x128xf32, #tpu.memory_space<vmem>>) attributes {dimension_semantics = [#tpu.dimension_semantics<arbitrary>, #tpu.dimension_semantics<arbitrary>], iteration_bounds = array<i64: 2, 3>, scalar_prefetch = 0 : i64, scratch_operands = 4 : i64, tpu.core_type = #tpu.core_type<tc>, window_params = [{transform_indices = @transform_0, window_bounds = array<i64: 24, 128>}, {transform_indices = @transform_1, window_bounds = array<i64: 1, 128, 512>}, {transform_indices = @transform_2, window_bounds = array<i64: 1, 128, 512>}, {transform_indices = @transform_3, window_bounds = array<i64: 1, 1, 512>}, {transform_indices = @transform_4, window_bounds = array<i64: 24, 128>}, {transform_indices = @transform_5, window_bounds = array<i64: 1, 8, 128>}, {transform_indices = @transform_6, window_bounds = array<i64: 1, 8, 128>}]} {
    %c24_i32 = arith.constant 24 : i32
    %0 = arith.muli %arg1, %c24_i32 : i32
    %1 = tpu.assume_multiple %0, 8 : i32
    %c0_i32 = arith.constant 0 : i32
    %2 = arith.cmpi eq, %arg1, %c0_i32 : i32
    %3 = arith.extui %2 : i1 to i32
    %c0_i32_0 = arith.constant 0 : i32
    %4 = arith.cmpi ne, %3, %c0_i32_0 : i32
    scf.if %4 {
      %cst_50 = arith.constant 0.000000e+00 : f32
      %146 = vector.broadcast %cst_50 : f32 to vector<8x128xf32>
      %c0_51 = arith.constant 0 : index
      %c0_52 = arith.constant 0 : index
      %147 = vector.load %arg11[%c0_51, %c0_52] : memref<8x128xf32, #tpu.memory_space<vmem>>, vector<8x128xf32>
      tpu.vector_store %arg11[%c0_51, %c0_52], %146 {strides = array<i32>} : memref<8x128xf32, #tpu.memory_space<vmem>>, vector<8x128xf32>,
      %cst_53 = arith.constant 0.000000e+00 : f32
      %148 = vector.broadcast %cst_53 : f32 to vector<8x128xf32>
      %c0_54 = arith.constant 0 : index
      %c0_55 = arith.constant 0 : index
      %149 = vector.load %arg12[%c0_54, %c0_55] : memref<8x128xf32, #tpu.memory_space<vmem>>, vector<8x128xf32>
      tpu.vector_store %arg12[%c0_54, %c0_55], %148 {strides = array<i32>} : memref<8x128xf32, #tpu.memory_space<vmem>>, vector<8x128xf32>,
    } else {
    }
    %c0 = arith.constant 0 : index
    %c0_1 = arith.constant 0 : index
    %c0_2 = arith.constant 0 : index
    %5 = vector.load %arg5[%c0, %c0_1, %c0_2] : memref<1x1x512xf32, #tpu.memory_space<vmem>>, vector<1x1x512xf32>
    %6 = vector.shape_cast %5 : vector<1x1x512xf32> to vector<1x512xf32>
    %c0_i32_3 = arith.constant 0 : i32
    %7 = arith.cmpi eq, %arg0, %c0_i32_3 : i32
    %8 = arith.extui %7 : i1 to i32
    %c0_i32_4 = arith.constant 0 : i32
    %9 = arith.cmpi ne, %8, %c0_i32_4 : i32
    scf.if %9 {
      %c0_50 = arith.constant 0 : index
      %c0_51 = arith.constant 0 : index
      %146 = vector.load %arg2[%c0_50, %c0_51] : memref<24x128xf32, #tpu.memory_space<vmem>>, vector<24x128xf32>
      %c0_52 = arith.constant 0 : index
      %c0_53 = arith.constant 0 : index
      %c0_54 = arith.constant 0 : index
      %147 = vector.load %arg3[%c0_52, %c0_53, %c0_54] : memref<1x128x512xf32, #tpu.memory_space<vmem>>, vector<1x128x512xf32>
      %148 = vector.shape_cast %147 : vector<1x128x512xf32> to vector<128x512xf32>
      %cst_55 = arith.constant dense<0.000000e+00> : vector<24x512xf32>
      %149 = tpu.matmul %146, %148, %cst_55 {dimension_numbers = #tpu.dot_dimension_numbers<[1], [0], [0], [1], [0, 0, 1, 1], [], []>} : vector<24x128xf32>, vector<128x512xf32>, vector<24x512xf32> -> vector<24x512xf32>
      %150 = vector.broadcast %6 : vector<1x512xf32> to vector<24x512xf32>
      %151 = arith.addf %149, %150 : vector<24x512xf32>
      %c0_56 = arith.constant 0 : index
      %c0_57 = arith.constant 0 : index
      %152 = vector.load %arg10[%c0_56, %c0_57] : memref<24x512xf32, #tpu.memory_space<vmem>>, vector<24x512xf32>
      tpu.vector_store %arg10[%c0_56, %c0_57], %151 {strides = array<i32>} : memref<24x512xf32, #tpu.memory_space<vmem>>, vector<24x512xf32>,
    } else {
    }
    %c0_i32_5 = arith.constant 0 : i32
    %10 = arith.cmpi sgt, %arg0, %c0_i32_5 : i32
    %11 = arith.extui %10 : i1 to i32
    %c0_i32_6 = arith.constant 0 : i32
    %12 = arith.cmpi ne, %11, %c0_i32_6 : i32
    scf.if %12 {
      %146 = arith.index_cast %1 : i32 to index
      %c0_50 = arith.constant 0 : index
      %147 = vector.load %arg9[%146, %c0_50] : memref<72x128xf32, #tpu.memory_space<vmem>>, vector<24x128xf32>
      %c0_51 = arith.constant 0 : index
      %c0_52 = arith.constant 0 : index
      %c0_53 = arith.constant 0 : index
      %148 = vector.load %arg3[%c0_51, %c0_52, %c0_53] : memref<1x128x512xf32, #tpu.memory_space<vmem>>, vector<1x128x512xf32>
      %149 = vector.shape_cast %148 : vector<1x128x512xf32> to vector<128x512xf32>
      %cst_54 = arith.constant dense<0.000000e+00> : vector<24x512xf32>
      %150 = tpu.matmul %147, %149, %cst_54 {dimension_numbers = #tpu.dot_dimension_numbers<[1], [0], [0], [1], [0, 0, 1, 1], [], []>} : vector<24x128xf32>, vector<128x512xf32>, vector<24x512xf32> -> vector<24x512xf32>
      %151 = vector.broadcast %6 : vector<1x512xf32> to vector<24x512xf32>
      %152 = arith.addf %150, %151 : vector<24x512xf32>
      %c0_55 = arith.constant 0 : index
      %c0_56 = arith.constant 0 : index
      %153 = vector.load %arg10[%c0_55, %c0_56] : memref<24x512xf32, #tpu.memory_space<vmem>>, vector<24x512xf32>
      tpu.vector_store %arg10[%c0_55, %c0_56], %152 {strides = array<i32>} : memref<24x512xf32, #tpu.memory_space<vmem>>, vector<24x512xf32>,
    } else {
    }
    %c0_7 = arith.constant 0 : index
    %c0_8 = arith.constant 0 : index
    %c0_9 = arith.constant 0 : index
    %13 = vector.load %arg4[%c0_7, %c0_8, %c0_9] : memref<1x128x512xf32, #tpu.memory_space<vmem>>, vector<1x128x512xf32>
    %14 = vector.shape_cast %13 : vector<1x128x512xf32> to vector<128x512xf32>
    %c1_i32 = arith.constant 1 : i32
    %15 = arith.cmpi eq, %arg0, %c1_i32 : i32
    %c0_10 = arith.constant 0 : index
    %c0_11 = arith.constant 0 : index
    %16 = vector.load %arg11[%c0_10, %c0_11] : memref<8x128xf32, #tpu.memory_space<vmem>>, vector<8x128xf32>
    %c0_12 = arith.constant 0 : index
    %c0_13 = arith.constant 0 : index
    %17 = vector.load %arg12[%c0_12, %c0_13] : memref<8x128xf32, #tpu.memory_space<vmem>>, vector<8x128xf32>
    %c0_i32_14 = arith.constant 0 : i32
    %c8_i32 = arith.constant 8 : i32
    %18 = arith.muli %c0_i32_14, %c8_i32 : i32
    %19 = tpu.assume_multiple %18, 8 : i32
    %20 = arith.index_cast %19 : i32 to index
    %c0_15 = arith.constant 0 : index
    %21 = vector.load %arg10[%20, %c0_15] : memref<24x512xf32, #tpu.memory_space<vmem>>, vector<8x512xf32>
    %cst = arith.constant dense<0.000000e+00> : vector<8x512xf32>
    %22 = tpu.matmul %16, %14, %cst {dimension_numbers = #tpu.dot_dimension_numbers<[1], [0], [0], [1], [0, 0, 1, 1], [], []>} : vector<8x128xf32>, vector<128x512xf32>, vector<8x512xf32> -> vector<8x512xf32>
    %23 = arith.addf %21, %22 : vector<8x512xf32>
    %24 = vector.extract_strided_slice %23 {offsets = [0, 0], sizes = [8, 128], strides = [1, 1]} : vector<8x512xf32> to vector<8x128xf32>
    %25 = arith.negf %24 : vector<8x128xf32>
    %26 = math.exp %25 : vector<8x128xf32>
    %cst_16 = arith.constant 1.000000e+00 : f32
    %27 = vector.broadcast %cst_16 : f32 to vector<8x128xf32>
    %28 = arith.addf %27, %26 : vector<8x128xf32>
    %29 = arith.divf %27, %28 : vector<8x128xf32>
    %30 = vector.extract_strided_slice %23 {offsets = [0, 128], sizes = [8, 128], strides = [1, 1]} : vector<8x512xf32> to vector<8x128xf32>
    %31 = arith.negf %30 : vector<8x128xf32>
    %32 = math.exp %31 : vector<8x128xf32>
    %cst_17 = arith.constant 1.000000e+00 : f32
    %33 = vector.broadcast %cst_17 : f32 to vector<8x128xf32>
    %34 = arith.addf %33, %32 : vector<8x128xf32>
    %35 = arith.divf %33, %34 : vector<8x128xf32>
    %36 = vector.extract_strided_slice %23 {offsets = [0, 256], sizes = [8, 128], strides = [1, 1]} : vector<8x512xf32> to vector<8x128xf32>
    %37 = math.tanh %36 : vector<8x128xf32>
    %38 = vector.extract_strided_slice %23 {offsets = [0, 384], sizes = [8, 128], strides = [1, 1]} : vector<8x512xf32> to vector<8x128xf32>
    %39 = arith.negf %38 : vector<8x128xf32>
    %40 = math.exp %39 : vector<8x128xf32>
    %cst_18 = arith.constant 1.000000e+00 : f32
    %41 = vector.broadcast %cst_18 : f32 to vector<8x128xf32>
    %42 = arith.addf %41, %40 : vector<8x128xf32>
    %43 = arith.divf %41, %42 : vector<8x128xf32>
    %44 = arith.mulf %35, %17 : vector<8x128xf32>
    %45 = arith.mulf %29, %37 : vector<8x128xf32>
    %46 = arith.addf %44, %45 : vector<8x128xf32>
    %47 = math.tanh %46 : vector<8x128xf32>
    %48 = arith.mulf %43, %47 : vector<8x128xf32>
    %49 = arith.addi %1, %19 : i32
    %50 = tpu.assume_multiple %49, 8 : i32
    %51 = arith.index_cast %50 : i32 to index
    %c0_19 = arith.constant 0 : index
    %52 = vector.load %arg9[%51, %c0_19] : memref<72x128xf32, #tpu.memory_space<vmem>>, vector<8x128xf32>
    tpu.vector_store %arg9[%51, %c0_19], %48 {strides = array<i32>} : memref<72x128xf32, #tpu.memory_space<vmem>>, vector<8x128xf32>,
    %53 = arith.extui %15 : i1 to i32
    %c0_i32_20 = arith.constant 0 : i32
    %54 = arith.cmpi ne, %53, %c0_i32_20 : i32
    scf.if %54 {
      %146 = arith.index_cast %19 : i32 to index
      %c0_50 = arith.constant 0 : index
      %147 = vector.load %arg6[%146, %c0_50] : memref<24x128xf32, #tpu.memory_space<vmem>>, vector<8x128xf32>
      tpu.vector_store %arg6[%146, %c0_50], %48 {strides = array<i32>} : memref<24x128xf32, #tpu.memory_space<vmem>>, vector<8x128xf32>,
    } else {
    }
    %c3_i32 = arith.constant 3 : i32
    %55 = arith.muli %arg1, %c3_i32 : i32
    %56 = arith.addi %55, %c0_i32_14 : i32
    %c7_i32 = arith.constant 7 : i32
    %57 = arith.cmpi eq, %56, %c7_i32 : i32
    %58 = arith.extui %57 : i1 to i32
    %c0_i32_21 = arith.constant 0 : i32
    %59 = arith.cmpi ne, %58, %c0_i32_21 : i32
    scf.if %59 {
      %c0_50 = arith.constant 0 : index
      %c0_51 = arith.constant 0 : index
      %c0_52 = arith.constant 0 : index
      %146 = vector.load %arg7[%c0_50, %c0_51, %c0_52] : memref<1x8x128xf32, #tpu.memory_space<vmem>>, vector<1x8x128xf32>
      %147 = vector.shape_cast %146 : vector<1x8x128xf32> to vector<8x128xf32>
      %148 = vector.shape_cast %48 : vector<8x128xf32> to vector<1x8x128xf32>
      tpu.vector_store %arg7[%c0_50, %c0_51, %c0_52], %148 {strides = array<i32>} : memref<1x8x128xf32, #tpu.memory_space<vmem>>, vector<1x8x128xf32>,
      %c0_53 = arith.constant 0 : index
      %c0_54 = arith.constant 0 : index
      %c0_55 = arith.constant 0 : index
      %149 = vector.load %arg8[%c0_53, %c0_54, %c0_55] : memref<1x8x128xf32, #tpu.memory_space<vmem>>, vector<1x8x128xf32>
      %150 = vector.shape_cast %149 : vector<1x8x128xf32> to vector<8x128xf32>
      %151 = vector.shape_cast %46 : vector<8x128xf32> to vector<1x8x128xf32>
      tpu.vector_store %arg8[%c0_53, %c0_54, %c0_55], %151 {strides = array<i32>} : memref<1x8x128xf32, #tpu.memory_space<vmem>>, vector<1x8x128xf32>,
    } else {
    }
    %c1_i32_22 = arith.constant 1 : i32
    %c8_i32_23 = arith.constant 8 : i32
    %60 = arith.muli %c1_i32_22, %c8_i32_23 : i32
    %61 = tpu.assume_multiple %60, 8 : i32
    %62 = arith.index_cast %61 : i32 to index
    %c0_24 = arith.constant 0 : index
    %63 = vector.load %arg10[%62, %c0_24] : memref<24x512xf32, #tpu.memory_space<vmem>>, vector<8x512xf32>
    %cst_25 = arith.constant dense<0.000000e+00> : vector<8x512xf32>
    %64 = tpu.matmul %48, %14, %cst_25 {dimension_numbers = #tpu.dot_dimension_numbers<[1], [0], [0], [1], [0, 0, 1, 1], [], []>} : vector<8x128xf32>, vector<128x512xf32>, vector<8x512xf32> -> vector<8x512xf32>
    %65 = arith.addf %63, %64 : vector<8x512xf32>
    %66 = vector.extract_strided_slice %65 {offsets = [0, 0], sizes = [8, 128], strides = [1, 1]} : vector<8x512xf32> to vector<8x128xf32>
    %67 = arith.negf %66 : vector<8x128xf32>
    %68 = math.exp %67 : vector<8x128xf32>
    %cst_26 = arith.constant 1.000000e+00 : f32
    %69 = vector.broadcast %cst_26 : f32 to vector<8x128xf32>
    %70 = arith.addf %69, %68 : vector<8x128xf32>
    %71 = arith.divf %69, %70 : vector<8x128xf32>
    %72 = vector.extract_strided_slice %65 {offsets = [0, 128], sizes = [8, 128], strides = [1, 1]} : vector<8x512xf32> to vector<8x128xf32>
    %73 = arith.negf %72 : vector<8x128xf32>
    %74 = math.exp %73 : vector<8x128xf32>
    %cst_27 = arith.constant 1.000000e+00 : f32
    %75 = vector.broadcast %cst_27 : f32 to vector<8x128xf32>
    %76 = arith.addf %75, %74 : vector<8x128xf32>
    %77 = arith.divf %75, %76 : vector<8x128xf32>
    %78 = vector.extract_strided_slice %65 {offsets = [0, 256], sizes = [8, 128], strides = [1, 1]} : vector<8x512xf32> to vector<8x128xf32>
    %79 = math.tanh %78 : vector<8x128xf32>
    %80 = vector.extract_strided_slice %65 {offsets = [0, 384], sizes = [8, 128], strides = [1, 1]} : vector<8x512xf32> to vector<8x128xf32>
    %81 = arith.negf %80 : vector<8x128xf32>
    %82 = math.exp %81 : vector<8x128xf32>
    %cst_28 = arith.constant 1.000000e+00 : f32
    %83 = vector.broadcast %cst_28 : f32 to vector<8x128xf32>
    %84 = arith.addf %83, %82 : vector<8x128xf32>
    %85 = arith.divf %83, %84 : vector<8x128xf32>
    %86 = arith.mulf %77, %46 : vector<8x128xf32>
    %87 = arith.mulf %71, %79 : vector<8x128xf32>
    %88 = arith.addf %86, %87 : vector<8x128xf32>
    %89 = math.tanh %88 : vector<8x128xf32>
    %90 = arith.mulf %85, %89 : vector<8x128xf32>
    %91 = arith.addi %1, %61 : i32
    %92 = tpu.assume_multiple %91, 8 : i32
    %93 = arith.index_cast %92 : i32 to index
    %c0_29 = arith.constant 0 : index
    %94 = vector.load %arg9[%93, %c0_29] : memref<72x128xf32, #tpu.memory_space<vmem>>, vector<8x128xf32>
    tpu.vector_store %arg9[%93, %c0_29], %90 {strides = array<i32>} : memref<72x128xf32, #tpu.memory_space<vmem>>, vector<8x128xf32>,
    %95 = arith.extui %15 : i1 to i32
    %c0_i32_30 = arith.constant 0 : i32
    %96 = arith.cmpi ne, %95, %c0_i32_30 : i32
    scf.if %96 {
      %146 = arith.index_cast %61 : i32 to index
      %c0_50 = arith.constant 0 : index
      %147 = vector.load %arg6[%146, %c0_50] : memref<24x128xf32, #tpu.memory_space<vmem>>, vector<8x128xf32>
      tpu.vector_store %arg6[%146, %c0_50], %90 {strides = array<i32>} : memref<24x128xf32, #tpu.memory_space<vmem>>, vector<8x128xf32>,
    } else {
    }
    %c3_i32_31 = arith.constant 3 : i32
    %97 = arith.muli %arg1, %c3_i32_31 : i32
    %98 = arith.addi %97, %c1_i32_22 : i32
    %c7_i32_32 = arith.constant 7 : i32
    %99 = arith.cmpi eq, %98, %c7_i32_32 : i32
    %100 = arith.extui %99 : i1 to i32
    %c0_i32_33 = arith.constant 0 : i32
    %101 = arith.cmpi ne, %100, %c0_i32_33 : i32
    scf.if %101 {
      %c0_50 = arith.constant 0 : index
      %c0_51 = arith.constant 0 : index
      %c0_52 = arith.constant 0 : index
      %146 = vector.load %arg7[%c0_50, %c0_51, %c0_52] : memref<1x8x128xf32, #tpu.memory_space<vmem>>, vector<1x8x128xf32>
      %147 = vector.shape_cast %146 : vector<1x8x128xf32> to vector<8x128xf32>
      %148 = vector.shape_cast %90 : vector<8x128xf32> to vector<1x8x128xf32>
      tpu.vector_store %arg7[%c0_50, %c0_51, %c0_52], %148 {strides = array<i32>} : memref<1x8x128xf32, #tpu.memory_space<vmem>>, vector<1x8x128xf32>,
      %c0_53 = arith.constant 0 : index
      %c0_54 = arith.constant 0 : index
      %c0_55 = arith.constant 0 : index
      %149 = vector.load %arg8[%c0_53, %c0_54, %c0_55] : memref<1x8x128xf32, #tpu.memory_space<vmem>>, vector<1x8x128xf32>
      %150 = vector.shape_cast %149 : vector<1x8x128xf32> to vector<8x128xf32>
      %151 = vector.shape_cast %88 : vector<8x128xf32> to vector<1x8x128xf32>
      tpu.vector_store %arg8[%c0_53, %c0_54, %c0_55], %151 {strides = array<i32>} : memref<1x8x128xf32, #tpu.memory_space<vmem>>, vector<1x8x128xf32>,
    } else {
    }
    %c2_i32 = arith.constant 2 : i32
    %c8_i32_34 = arith.constant 8 : i32
    %102 = arith.muli %c2_i32, %c8_i32_34 : i32
    %103 = tpu.assume_multiple %102, 8 : i32
    %104 = arith.index_cast %103 : i32 to index
    %c0_35 = arith.constant 0 : index
    %105 = vector.load %arg10[%104, %c0_35] : memref<24x512xf32, #tpu.memory_space<vmem>>, vector<8x512xf32>
    %cst_36 = arith.constant dense<0.000000e+00> : vector<8x512xf32>
    %106 = tpu.matmul %90, %14, %cst_36 {dimension_numbers = #tpu.dot_dimension_numbers<[1], [0], [0], [1], [0, 0, 1, 1], [], []>} : vector<8x128xf32>, vector<128x512xf32>, vector<8x512xf32> -> vector<8x512xf32>
    %107 = arith.addf %105, %106 : vector<8x512xf32>
    %108 = vector.extract_strided_slice %107 {offsets = [0, 0], sizes = [8, 128], strides = [1, 1]} : vector<8x512xf32> to vector<8x128xf32>
    %109 = arith.negf %108 : vector<8x128xf32>
    %110 = math.exp %109 : vector<8x128xf32>
    %cst_37 = arith.constant 1.000000e+00 : f32
    %111 = vector.broadcast %cst_37 : f32 to vector<8x128xf32>
    %112 = arith.addf %111, %110 : vector<8x128xf32>
    %113 = arith.divf %111, %112 : vector<8x128xf32>
    %114 = vector.extract_strided_slice %107 {offsets = [0, 128], sizes = [8, 128], strides = [1, 1]} : vector<8x512xf32> to vector<8x128xf32>
    %115 = arith.negf %114 : vector<8x128xf32>
    %116 = math.exp %115 : vector<8x128xf32>
    %cst_38 = arith.constant 1.000000e+00 : f32
    %117 = vector.broadcast %cst_38 : f32 to vector<8x128xf32>
    %118 = arith.addf %117, %116 : vector<8x128xf32>
    %119 = arith.divf %117, %118 : vector<8x128xf32>
    %120 = vector.extract_strided_slice %107 {offsets = [0, 256], sizes = [8, 128], strides = [1, 1]} : vector<8x512xf32> to vector<8x128xf32>
    %121 = math.tanh %120 : vector<8x128xf32>
    %122 = vector.extract_strided_slice %107 {offsets = [0, 384], sizes = [8, 128], strides = [1, 1]} : vector<8x512xf32> to vector<8x128xf32>
    %123 = arith.negf %122 : vector<8x128xf32>
    %124 = math.exp %123 : vector<8x128xf32>
    %cst_39 = arith.constant 1.000000e+00 : f32
    %125 = vector.broadcast %cst_39 : f32 to vector<8x128xf32>
    %126 = arith.addf %125, %124 : vector<8x128xf32>
    %127 = arith.divf %125, %126 : vector<8x128xf32>
    %128 = arith.mulf %119, %88 : vector<8x128xf32>
    %129 = arith.mulf %113, %121 : vector<8x128xf32>
    %130 = arith.addf %128, %129 : vector<8x128xf32>
    %131 = math.tanh %130 : vector<8x128xf32>
    %132 = arith.mulf %127, %131 : vector<8x128xf32>
    %133 = arith.addi %1, %103 : i32
    %134 = tpu.assume_multiple %133, 8 : i32
    %135 = arith.index_cast %134 : i32 to index
    %c0_40 = arith.constant 0 : index
    %136 = vector.load %arg9[%135, %c0_40] : memref<72x128xf32, #tpu.memory_space<vmem>>, vector<8x128xf32>
    tpu.vector_store %arg9[%135, %c0_40], %132 {strides = array<i32>} : memref<72x128xf32, #tpu.memory_space<vmem>>, vector<8x128xf32>,
    %137 = arith.extui %15 : i1 to i32
    %c0_i32_41 = arith.constant 0 : i32
    %138 = arith.cmpi ne, %137, %c0_i32_41 : i32
    scf.if %138 {
      %146 = arith.index_cast %103 : i32 to index
      %c0_50 = arith.constant 0 : index
      %147 = vector.load %arg6[%146, %c0_50] : memref<24x128xf32, #tpu.memory_space<vmem>>, vector<8x128xf32>
      tpu.vector_store %arg6[%146, %c0_50], %132 {strides = array<i32>} : memref<24x128xf32, #tpu.memory_space<vmem>>, vector<8x128xf32>,
    } else {
    }
    %c3_i32_42 = arith.constant 3 : i32
    %139 = arith.muli %arg1, %c3_i32_42 : i32
    %140 = arith.addi %139, %c2_i32 : i32
    %c7_i32_43 = arith.constant 7 : i32
    %141 = arith.cmpi eq, %140, %c7_i32_43 : i32
    %142 = arith.extui %141 : i1 to i32
    %c0_i32_44 = arith.constant 0 : i32
    %143 = arith.cmpi ne, %142, %c0_i32_44 : i32
    scf.if %143 {
      %c0_50 = arith.constant 0 : index
      %c0_51 = arith.constant 0 : index
      %c0_52 = arith.constant 0 : index
      %146 = vector.load %arg7[%c0_50, %c0_51, %c0_52] : memref<1x8x128xf32, #tpu.memory_space<vmem>>, vector<1x8x128xf32>
      %147 = vector.shape_cast %146 : vector<1x8x128xf32> to vector<8x128xf32>
      %148 = vector.shape_cast %132 : vector<8x128xf32> to vector<1x8x128xf32>
      tpu.vector_store %arg7[%c0_50, %c0_51, %c0_52], %148 {strides = array<i32>} : memref<1x8x128xf32, #tpu.memory_space<vmem>>, vector<1x8x128xf32>,
      %c0_53 = arith.constant 0 : index
      %c0_54 = arith.constant 0 : index
      %c0_55 = arith.constant 0 : index
      %149 = vector.load %arg8[%c0_53, %c0_54, %c0_55] : memref<1x8x128xf32, #tpu.memory_space<vmem>>, vector<1x8x128xf32>
      %150 = vector.shape_cast %149 : vector<1x8x128xf32> to vector<8x128xf32>
      %151 = vector.shape_cast %130 : vector<8x128xf32> to vector<1x8x128xf32>
      tpu.vector_store %arg8[%c0_53, %c0_54, %c0_55], %151 {strides = array<i32>} : memref<1x8x128xf32, #tpu.memory_space<vmem>>, vector<1x8x128xf32>,
    } else {
    }
    %c3_i32_45 = arith.constant 3 : i32
    %c0_46 = arith.constant 0 : index
    %c0_47 = arith.constant 0 : index
    %144 = vector.load %arg11[%c0_46, %c0_47] : memref<8x128xf32, #tpu.memory_space<vmem>>, vector<8x128xf32>
    tpu.vector_store %arg11[%c0_46, %c0_47], %132 {strides = array<i32>} : memref<8x128xf32, #tpu.memory_space<vmem>>, vector<8x128xf32>,
    %c0_48 = arith.constant 0 : index
    %c0_49 = arith.constant 0 : index
    %145 = vector.load %arg12[%c0_48, %c0_49] : memref<8x128xf32, #tpu.memory_space<vmem>>, vector<8x128xf32>
    tpu.vector_store %arg12[%c0_48, %c0_49], %130 {strides = array<i32>} : memref<8x128xf32, #tpu.memory_space<vmem>>, vector<8x128xf32>,
    return
  }
  func.func @transform_0(%arg0: i32, %arg1: i32) -> (i32, i32) {
    %c0_i32 = arith.constant 0 : i32
    %0 = arith.cmpi eq, %arg0, %c0_i32 : i32
    %c2_i32 = arith.constant 2 : i32
    %1 = arith.select %0, %arg1, %c2_i32 : i32
    %c0_i32_0 = arith.constant 0 : i32
    %c0_i32_1 = arith.constant 0 : i32
    return %1, %c0_i32_0 : i32, i32
  }
  func.func @transform_1(%arg0: i32, %arg1: i32) -> (i32, i32, i32) {
    %c0_i32 = arith.constant 0 : i32
    %c0_i32_0 = arith.constant 0 : i32
    %c0_i32_1 = arith.constant 0 : i32
    return %arg0, %c0_i32, %c0_i32_0 : i32, i32, i32
  }
  func.func @transform_2(%arg0: i32, %arg1: i32) -> (i32, i32, i32) {
    %c0_i32 = arith.constant 0 : i32
    %c0_i32_0 = arith.constant 0 : i32
    %c0_i32_1 = arith.constant 0 : i32
    return %arg0, %c0_i32, %c0_i32_0 : i32, i32, i32
  }
  func.func @transform_3(%arg0: i32, %arg1: i32) -> (i32, i32, i32) {
    %c0_i32 = arith.constant 0 : i32
    %c0_i32_0 = arith.constant 0 : i32
    %c0_i32_1 = arith.constant 0 : i32
    return %arg0, %c0_i32, %c0_i32_0 : i32, i32, i32
  }
  func.func @transform_4(%arg0: i32, %arg1: i32) -> (i32, i32) {
    %c1_i32 = arith.constant 1 : i32
    %0 = arith.cmpi eq, %arg0, %c1_i32 : i32
    %c0_i32 = arith.constant 0 : i32
    %1 = arith.select %0, %arg1, %c0_i32 : i32
    %c0_i32_0 = arith.constant 0 : i32
    %c0_i32_1 = arith.constant 0 : i32
    return %1, %c0_i32_0 : i32, i32
  }
  func.func @transform_5(%arg0: i32, %arg1: i32) -> (i32, i32, i32) {
    %c0_i32 = arith.constant 0 : i32
    %c0_i32_0 = arith.constant 0 : i32
    %c0_i32_1 = arith.constant 0 : i32
    return %arg0, %c0_i32, %c0_i32_0 : i32, i32, i32
  }
  func.func @transform_6(%arg0: i32, %arg1: i32) -> (i32, i32, i32) {
    %c0_i32 = arith.constant 0 : i32
    %c0_i32_0 = arith.constant 0 : i32
    %c0_i32_1 = arith.constant 0 : i32
    return %arg0, %c0_i32, %c0_i32_0 : i32, i32, i32
  }
}

</mosaic_0001>

<bundles_post_ra>
// kernel: tpu_custom_call.1
= control target key start
LH: loop header
LB: loop body
LE: loop exit
PB: predicated region body
PF: predicated region fallthrough
CT: control target
= control target key end

     0   :  { %s3572_s0 = inlined_call_operand.hbm [shape: f32[72,128], index: 0, kind: input, shape index: {}]   ;;  %s3573_s1 = inlined_call_operand.hbm [shape: f32[2,128,512], index: 1, kind: input, shape index: {}]   ;;  %s3574_s2 = inlined_call_operand.hbm [shape: f32[2,128,512], index: 2, kind: input, shape index: {}]   ;;  %s3575_s3 = inlined_call_operand.hbm [shape: f32[2,1,512], index: 3, kind: input, shape index: {}]   ;;  %s3576_s4 = inlined_call_operand.hbm [shape: f32[72,128], index: 4, kind: output, shape index: {0}]   ;;  %s3577_s5 = inlined_call_operand.hbm [shape: f32[2,8,128], index: 5, kind: output, shape index: {1}]   ;;  %s3578_s6 = inlined_call_operand.hbm [shape: f32[2,8,128], index: 6, kind: output, shape index: {2}]  }
   0x1   :  { %3630 = sst [smem:[#allocation57_spill]] %s3572_s0 }
   0x2   :  { %3631 = sst [smem:[#allocation58_spill]] %s3573_s1 }
   0x3   :  { %3632 = sst [smem:[#allocation59_spill]] %s3574_s2 }
   0x4   :  { %3633 = sst [smem:[#allocation60_spill]] %s3575_s3 }
   0x5   :  { %3634 = sst [smem:[#allocation61_spill]] %s3576_s4 }
   0x6   :  { %3635 = sst [smem:[#allocation62_spill]] %s3577_s5 }
   0x7   :  { %3636 = sst [smem:[#allocation63_spill]] %s3578_s6 }
   0x8   :  { %12 = vsyncpa [#allocation7], 0 }
   0x9   :  { %14 = vsyncpa [#allocation7 + $0x1], 0 }
   0xa   :  { %15 = vsyncpa [#allocation10], 0 }
   0xb   :  { %17 = vsyncpa [#allocation10 + $0x1], 0 }
   0xc   :  { %18 = vsyncpa [#allocation13], 0 }
   0xd   :  { %20 = vsyncpa [#allocation13 + $0x1], 0 }
   0xe   :  { %21 = vsyncpa [#allocation8], 0 }
   0xf   :  { %23 = vsyncpa [#allocation8 + $0x1], 0 }
  0x10   :  { %24 = vsyncpa [#allocation16], 0 }
  0x11   :  { %26 = vsyncpa [#allocation16 + $0x1], 0  ;;  %s2539_s21 = smov 0   ;;  %s2541_s22 = smov 0  }
  0x12   :  { %s2543_s23 = smov 0   ;;  %s2545_s24 = smov 0  }
  0x13   :  { %s2547_s25 = smov 0   ;;  %s2549_s26 = smov 0  }
  0x14   :  { %s2551_s27 = smov 0   ;;  %s2553_s28 = smov 0  }
  0x15   :  { %s2555_s29 = smov 0   ;;  %s2557_s30 = smov 0  }
  0x16   :  { %s2559_s7 = smov 0   ;;  %s2561_s8 = smov 0  }
  0x17   :  { %s2563_s9 = smov 0   ;;  %s2565_s10 = smov 0  }
  0x18 LB: > { %3637 = sst [smem:[#allocation23_spill]] %s2449_s25  ;;  %s2610_s11 = sadd.s32 4294967295, %s2485_s10   ;;  %s2485_s10 = sphi %s2565_s10, %s32_s10   ;;  %s2481_s9 = sphi %s2563_s9, %s3777_s9   ;;  %s2477_s8 = sphi %s2561_s8, %s3768_s8   ;;  %s2473_s7 = sphi %s2559_s7, %s3776_s7   ;;  %s2469_s30 = sphi %s2557_s30, %s3767_s30   ;;  %s2465_s29 = sphi %s2555_s29, %s3766_s29   ;;  %s2461_s28 = sphi %s2553_s28, %s3765_s28   ;;  %s2457_s27 = sphi %s2551_s27, %s3764_s27   ;;  %s2453_s26 = sphi %s2549_s26, %s3775_s26   ;;  %s2449_s25 = sphi %s2547_s25, %s3774_s25   ;;  %s2445_s24 = sphi %s2545_s24, %s3762_s24   ;;  %s2441_s23 = sphi %s2543_s23, %s3773_s23   ;;  %s2437_s22 = sphi %s2541_s22, %s3772_s22   ;;  %s2433_s21 = sphi %s2539_s21, %s3771_s21  }
  0x19   : > { %3638 = sst [smem:[#allocation24_spill]] %s2461_s28  ;;  %s3579_s12 = sadd.s32 4294967294, %s2485_s10  }
  0x1a   : > { %3639 = sst [smem:[#allocation25_spill]] %s2465_s29  ;;  %p63_p0 = scmp.eq.s32.totalorder %s2485_s10, 0 }
  0x1b   : > { %3640 = sst [smem:[#allocation26_spill]] %s2469_s30  ;;  %p88_p1 = scmp.ne.s32.totalorder %s2453_s26, %s2449_s25 }
  0x1c   : > { %3641 = sst [smem:[#allocation27_spill]] %s2473_s7  ;;  %p94_p2 = scmp.ne.s32.totalorder %s2449_s25, %s2445_s24 }
  0x1d   : > { %3642 = sst [smem:[#allocation28_spill]] %s2477_s8  ;;  %p3589_p3 = scmp.eq.s32.totalorder %s2610_s11, 5 }
  0x1e   : > { %p2622_p4 = scmp.eq.s32.totalorder %s3579_s12, 5  ;;  %p90_p5 = por %p88_p1, %p63_p0 }
  0x1f   : > { %p2630_p6 = por %p3589_p3, %p88_p1  ;;  %p3588_p8 = scmp.lt.s32.totalorder %s2485_s10, 6 }
  0x20   : > { %p2639_p7 = por %p2622_p4, %p94_p2  ;;  %s275_s17 = sand.u32 1, %s2485_s10  }
  0x21   : > { %s3644_s15 = scalar_select %p2630_p6, 1, 0 }
  0x22   : > { %s3646_s16 = scalar_select %p2639_p7, 1, 0 }
  0x23   : > { %3645 = sst [smem:[#allocation29_spill]] %s3644_s15  ;;  %s2646_s18 = sand.u32 1, %s2453_s26  }
  0x24   : > { %3647 = sst [smem:[#allocation30_spill]] %s3646_s16  ;;  %s3590_s19 = sshll.u32 %s2646_s18, 9 }
  0x25   : > { %s1949_s20 = sshll.u32 %s2481_s9, 13  ;;  %s3648_s1 = sld [smem:[#allocation58_spill]] }
  0x26   : > { %s279_s6 = scalar_lea.vmem [#allocation9], %s3590_s19  ;;  %p2657_p9 = pnand %p3588_p8, %p90_p5 }
  0x27   : > { %s286_s5 = sshll.u32 %s279_s6, 4  ;;  %s2661_s16 = scalar_lea.sflag [#allocation10], %s275_s17  ;;  %s287_s5 = int_to_ptr.vmem [resolvable:$true] %s286_s5 }
  0x28   : > { %p3592_p10 = pneg %p2657_p9  ;;  %s2178_s7 = scalar_lea.vmem %s287_s5, 8192 }
  0x29   : > { %p2179_p11 = scmp.ne.s32.totalorder %s287_s5, %s2178_s7  ;;  %s2487_s12 = smov [#allocation9]  }
  0x2a   : > { %s2183_s6 = sshll.u32 %s2487_s12, 4  ;;  %s2184_s6 = int_to_ptr.vmem [resolvable:$false] %s2183_s6 }
  0x2b   : > { %s285_s4 = scalar_lea.hbm %s3648_s1, %s1949_s20  ;;  %p2181_p12 = pnand %p2179_p11, %p3592_p10 }
  0x2c   : > { %s2185_s13 = scalar_lea.vmem %s2184_s6, 16384  ;;  %p2186_p1 = scmp.lt.s32.totalorder %s287_s5, %s2184_s6 }
  0x2d   : > { %p2182_p13 = pneg %p2181_p12  ;;  %p2187_p5 = scmp.lt.s32.totalorder %s2185_s13, %s2178_s7 }
  0x2f   : > { %p2188_p8 = por %p2187_p5, %p2186_p1 }
  0x31   : > { %p2189_p3 = pnand %p2188_p8, %p2182_p13 }
  0x33   : > { %2192 = shalt.err (!%p2189_p3)
}
  0x34   : > { %s3593_s19 = smov 512   ;;  %s3594_s17 = smov 32  }
  0x35   : > { %1976 = dma.hbm_to_vmem [thread:$0]  (!%p2657_p9), %s285_s4, 8192, %s287_s5, %s2661_s16, %s3593_s19, %s3593_s19, %s3594_s17  }
  0x36   : > { %s3650_s2 = sld [smem:[#allocation59_spill]]  ;;  %s3651_s13 = sshll.u32 %s2646_s18, 9 }
  0x37   : > { %s300_s1 = scalar_lea.vmem [#allocation11], %s3651_s13  ;;  %p1913_p3 = scmp.ge.s32.totalorder %s2485_s10, 1 }
  0x38   : > { %s307_s30 = sshll.u32 %s300_s1, 4  ;;  %p334_p8 = scmp.lt.s32.totalorder %s2485_s10, 7  ;;  %s2682_s30 = int_to_ptr.vmem [resolvable:$true] %s307_s30 }
  0x39   : > { %s41_s5 = sadd.s32 1, %s2477_s8  ;;  %p48_p13 = scmp.eq.s32.totalorder %s2481_s9, 0 }
  0x3a   : > { %p2685_p11 = pnand %p1913_p3, %p334_p8  ;;  %p42_p12 = scmp.ge.s32.totalorder %s41_s5, 3 }
  0x3b   : > { %s55_s7 = sadd.s32 1, %s2465_s29  ;;  %p62_p5 = scmp.ne.s32.totalorder %s2465_s29, %s2461_s28 }
  0x3c   : > { %s2677_s6 = scalar_lea.hbm %s3650_s2, %s1949_s20  ;;  %s44_s20 = sadd.s32 1, %s2481_s9 }
  0x3d   : > { %s3652_s4 = scalar_select %p2685_p11, 1, 0 }
  0x3e   : > { %s3779_s5 = smov (%p42_p12, %s41_s5), 0  ;;  %s3781_s20 = smov (!%p42_p12, %s44_s20), %s2481_s9 }
  0x3f   : > { %3653 = sst [smem:[#allocation31_spill]] %s3652_s4  ;;  %p46_p1 = scmp.ge.s32.totalorder %s3781_s20, 2 }
  0x40   : > { %3654 = sst [smem:[#allocation32_spill]] %s3779_s5  ;;  %p68_p3 = scmp.ne.s32.totalorder %s2461_s28, %s2457_s27 }
  0x41   : > { %s2697_s1 = scalar_select %p48_p13, %s2477_s8, 2 }
  0x42   : > { %p69_p8 = scmp.eq.s32.totalorder %s2610_s11, 0  ;;  %s3783_s20 = smov (%p46_p1, %s3781_s20), 0 }
  0x43   : > { %3655 = sst [smem:[#allocation33_spill]] %s3783_s20  ;;  %p2708_p10 = por %p63_p0, %p62_p5 }
  0x44   : > { %p2712_p12 = por %p69_p8, %p68_p3  ;;  %p50_p13 = scmp.eq.s32.totalorder %s3783_s20, 0 }
  0x45   : > { %s78_s27 = ssub.s32 %s2481_s9, %s3783_s20  ;;  %p2722_p7 = por %p94_p2, %p69_p8 }
  0x46   : > { %s3657_s13 = scalar_select %p2712_p12, 1, 0 }
  0x47   : > { %p79_p1 = scmp.eq.s32.totalorder %s78_s27, 0  ;;  %s3661_s2 = sadd.s32 1, %s2453_s26 }
  0x48   : > { %3658 = sst [smem:[#allocation34_spill]] %s3657_s13  ;;  %p156_p0 = scmp.eq.s32.totalorder %s2481_s9, 1 }
  0x49   : > { %s3659_s19 = scalar_select %p2722_p7, 1, 0 }
  0x4a   : > { %s51_s17 = scalar_select %p50_p13, %s3779_s5, 2 }
  0x4b   : > { %3660 = sst [smem:[#allocation35_spill]] %s3659_s19  ;;  %p158_p3 = scmp.eq.s32.totalorder %s3783_s20, 1 }
  0x4c   : > { %s2730_s28 = scalar_select %p79_p1, %s2453_s26, %s3661_s2  }
  0x4d   : > { %s52_s4 = ssub.s32 %s2697_s1, %s51_s17  ;;  %s163_s13 = sadd.s32 1, %s2441_s23 }
  0x4e   : > { %3662 = sst [smem:[#allocation36_spill]] %s2730_s28  ;;  %p53_p5 = scmp.eq.s32.totalorder %s52_s4, 0 }
  0x4f   : > { %s157_s24 = scalar_select %p156_p0, %s2477_s8, 0 }
  0x50   : > { %s2737_s27 = scalar_select %p53_p5, %s2465_s29, %s55_s7  }
  0x51   : > { %s159_s25 = scalar_select %p158_p3, %s3779_s5, 0 }
  0x52   : > { %3663 = sst [smem:[#allocation37_spill]] %s2737_s27  ;;  %p173_p2 = scmp.ne.s32.totalorder %s2441_s23, %s2437_s22 }
  0x53   : > { %s160_s19 = ssub.s32 %s157_s24, %s159_s25  ;;  %p179_p8 = scmp.ne.s32.totalorder %s2437_s22, %s2433_s21 }
  0x54   : > { %p161_p13 = scmp.eq.s32.totalorder %s160_s19, 0  ;;  %p3664_p6 = scmp.eq.s32.totalorder %s2610_s11, 5 }
  0x55   : > { %p2753_p7 = por %p2622_p4, %p179_p8  ;;  %s252_s4 = sand.u32 1, %s2465_s29  }
  0x56   : > { %p2747_p1 = por %p3664_p6, %p173_p2  ;;  %s1953_s7 = smul.u32 24, %s252_s4 }
  0x57   : > { %s3666_s17 = scalar_select %p2753_p7, 1, 0 }
  0x58   : > { %s2759_s20 = scalar_select %p161_p13, %s2441_s23, %s163_s13  }
  0x59   : > { %s1948_s5 = smul.u32 384, %s2697_s1  ;;  %p3667_p0 = scmp.lt.s32.totalorder %s2485_s10, 6 }
  0x5a   : > { %s3669_s0 = sld [smem:[#allocation57_spill]]  ;;  %s256_s8 = scalar_lea.vmem [#allocation6], %s1953_s7 }
  0x5b   : > { %p2766_p5 = pnand %p3667_p0, %p2708_p10  ;;  %s265_s27 = sshll.u32 %s256_s8, 4  ;;  %s266_s27 = int_to_ptr.vmem [resolvable:$true] %s265_s27 }
  0x5c   : > { %s253_s28 = scalar_lea.sflag [#allocation7], %s252_s4  ;;  %s2206_s13 = scalar_lea.vmem %s266_s27, 384 }
  0x5d   : > { %p2195_p4 = pneg %p2766_p5  ;;  %p2207_p6 = scmp.ne.s32.totalorder %s266_s27, %s2206_s13 }
  0x5e   : > { %s2490_s1 = smov [#allocation6]  }
  0x5f   : > { %p2209_p3 = pnand %p2207_p6, %p2195_p4  ;;  %s2211_s12 = sshll.u32 %s2490_s1, 4  ;;  %s2212_s12 = int_to_ptr.vmem [resolvable:$false] %s2211_s12 }
  0x60   : > { %s264_s14 = scalar_lea.hbm %s3669_s0, %s1948_s5  ;;  %s2213_s29 = scalar_lea.vmem %s2212_s12, 768 }
  0x61   : > { %p2210_p2 = pneg %p2209_p3  ;;  %p2214_p10 = scmp.lt.s32.totalorder %s266_s27, %s2212_s12 }
  0x62   : > { %p2215_p8 = scmp.lt.s32.totalorder %s2213_s29, %s2206_s13 }
  0x64   : > { %p2216_p13 = por %p2215_p8, %p2214_p10 }
  0x66   : > { %p2217_p0 = pnand %p2216_p13, %p2210_p2 }
  0x68   : > { %2220 = shalt.err (!%p2217_p0)
}
  0x69   : > { %s2491_s5 = smov 128   ;;  %s2492_s8 = smov 8  }
  0x6a   : > { %1973 = dma.hbm_to_vmem [thread:$0]  (!%p2766_p5), %s264_s14, 384, %s266_s27, %s253_s28, %s2491_s5, %s2491_s5, %s2492_s8  }
  0x6b   : > { %s2234_s4 = scalar_lea.vmem %s2682_s30, 8192  ;;  %p3670_p6 = pneg %p2657_p9 }
  0x6c   : > { %p2235_p4 = scmp.ne.s32.totalorder %s2682_s30, %s2234_s4  ;;  %s2493_s7 = smov [#allocation11]  }
  0x6d   : > { %s2239_s29 = sshll.u32 %s2493_s7, 4  ;;  %s2240_s29 = int_to_ptr.vmem [resolvable:$false] %s2239_s29 }
  0x6e   : > { %p2237_p3 = pnand %p2235_p4, %p3670_p6  ;;  %s2241_s19 = scalar_lea.vmem %s2240_s29, 16384 }
  0x6f   : > { %p2242_p2 = scmp.lt.s32.totalorder %s2682_s30, %s2240_s29  ;;  %p2243_p10 = scmp.lt.s32.totalorder %s2241_s19, %s2234_s4 }
  0x70   : > { %p2238_p7 = pneg %p2237_p3 }
  0x71   : > { %p2244_p8 = por %p2243_p10, %p2242_p2 }
  0x73   : > { %p2245_p13 = pnand %p2244_p8, %p2238_p7 }
  0x75   : > { %2248 = shalt.err (!%p2245_p13)
}
  0x76   : > { %s3671_s24 = smov 32   ;;  %s3672_s25 = smov 512  }
  0x77   : > { %1979 = dma.hbm_to_vmem [thread:$0]  (!%p2657_p9), %s2677_s6, 8192, %s2682_s30, %s2661_s16, %s3672_s25, %s3672_s25, %s3671_s24  }
  0x78   : > { %s1910_s28 = sshll.u32 %s2646_s18, 2  ;;  %s1951_s27 = sshll.u32 %s2481_s9, 6 }
  0x79   : > { %s3673_s3 = sld [smem:[#allocation60_spill]]  ;;  %s321_s12 = scalar_lea.vmem [#allocation12], %s1910_s28 }
  0x7a   : > { %s329_s5 = sshll.u32 %s321_s12, 4  ;;  %s318_s8 = scalar_lea.sflag [#allocation13], %s2646_s18  ;;  %s330_s5 = int_to_ptr.vmem [resolvable:$true] %s329_s5 }
  0x7b   : > { %s2262_s4 = scalar_lea.vmem %s330_s5, 64  ;;  %p3674_p5 = pmov %p3670_p6 }
  0x7c   : > { %p2263_p7 = scmp.ne.s32.totalorder %s330_s5, %s2262_s4  ;;  %s2494_s7 = smov [#allocation12]  }
  0x7d   : > { %s2267_s29 = sshll.u32 %s2494_s7, 4  ;;  %s2268_s29 = int_to_ptr.vmem [resolvable:$false] %s2267_s29 }
  0x7e   : > { %p2265_p0 = pnand %p2263_p7, %p3674_p5  ;;  %s2269_s30 = scalar_lea.vmem %s2268_s29, 128 }
  0x7f   : > { %s327_s1 = scalar_lea.hbm %s3673_s3, %s1951_s27  ;;  %p2270_p6 = scmp.lt.s32.totalorder %s330_s5, %s2268_s29 }
  0x80   : > { %p2266_p4 = pneg %p2265_p0  ;;  %p2271_p3 = scmp.lt.s32.totalorder %s2269_s30, %s2262_s4 }
  0x82   : > { %p2272_p2 = por %p2271_p3, %p2270_p6 }
  0x84   : > { %p2273_p10 = pnand %p2272_p2, %p2266_p4 }
  0x86   : > { %2276 = shalt.err (!%p2273_p10)
}
  0x87   : > { %1982 = dma.hbm_to_vmem [thread:$0]  (!%p2657_p9), %s327_s1, 64, %s330_s5, %s318_s8  }
  0x88   : > { %338 = sbr.rel (%p2685_p11) target bundleno = 1648 (0x670), region = 36 }
  0x8d   : > { %s3676_s18 = sld [smem:[#allocation24_spill]] }
  0x93   : > { %s340_s19 = sand.u32 1, %s3676_s18  }
  0x94   : > { %s1954_s24 = smul.u32 24, %s340_s19  ;;  %s341_s25 = scalar_lea.sflag [#allocation7], %s340_s19 }
  0x96   : > { %s2805_s28 = scalar_lea.vmem [#allocation6], %s1954_s24 }
  0x97   : > { %2412 = dma.done.wait (%p2712_p12), %s341_s25, 384  }
  0x98   : > { %2414 = vsyncadd (%p2712_p12), %s341_s25, 4294966912  ;;  %s3678_s27 = sld [smem:[#allocation23_spill]]  ;;  %s349_s14 = sand.u32 1, %s2610_s11  }
  0x99   : > { %s3679_s15 = sld [smem:[#allocation35_spill]]  ;;  %s350_s12 = scalar_lea.sflag [#allocation10], %s349_s14 }
  0x9e   : > { %s351_s13 = sand.u32 1, %s3678_s27  }
  0x9f   : > { %s1914_s1 = sshll.u32 %s351_s13, 9  ;;  %p3680_p9 = scmp.ne.s32.totalorder %s3679_s15, 0 }
  0xa0   : > { %s2815_s5 = scalar_lea.vmem [#allocation9], %s1914_s1 }
  0xa1   : > { %2416 = dma.done.wait (%p3680_p9), %s350_s12, 16384  }
  0xa2   : > { %2418 = vsyncadd (%p3680_p9), %s350_s12, 4294950912  ;;  %s1916_s8 = sshll.u32 %s351_s13, 2  ;;  %s2821_s4 = scalar_lea.vmem [#allocation11], %s1914_s1 }
  0xa3   : > { %s368_s7 = scalar_lea.sflag [#allocation13], %s351_s13  ;;  %s371_s29 = scalar_lea.vmem [#allocation12], %s1916_s8 }
  0xa4   : > { %2420 = dma.done.wait (%p3680_p9), %s368_s7, 64  }
  0xa5   : > { %2422 = vsyncadd (%p3680_p9), %s368_s7, 4294967232  ;;  %s3681_s30 = sld [smem:[#allocation26_spill]]  ;;  %s408_s16 = sand.u32 1, %s2437_s22  }
  0xa6   : > { %s1917_s18 = sshll.u32 %s351_s13, 3  ;;  %s1955_s6 = smul.u32 24, %s408_s16 }
  0xa7   : > { %s2833_s25 = scalar_lea.vmem [#allocation15], %s1917_s18  ;;  %s2835_s27 = scalar_lea.vmem [#allocation17], %s1917_s18 }
  0xa8   : > { %s2831_s24 = scalar_lea.vmem [#allocation14], %s1955_s6 }
  0xab   : > { %s431_s19 = smul.u32 24, %s3681_s30  ;;  %p1919_p11 = scmp.ne.s32.totalorder %s3681_s30, 0 }
  0xad   : > { %435 = sbr.rel (%p1919_p11) target bundleno = 180 (0xb4), region = 56 }
  0xb2   : > { %v2495_v0 = vmov 0.0  }
  0xb3   : > { %436 = vst [vmem:[#allocation4] sm:$0xff] %v2495_v0  ;;  %437 = vst [vmem:[#allocation5] sm:$0xff] %v2495_v0 }
  0xb4 PF: > { %v2838_v1 = vld [vmem:[%s371_s29] sm:$0xf]  ;;  %s3682_s15 = sld [smem:[#allocation27_spill]] }
  0xba   : > { %p1920_p12 = scmp.ne.s32.totalorder %s3682_s15, 0 }
  0xbc   : > { %442 = sbr.rel (%p1920_p12) target bundleno = 433 (0x1b1), region = 60 }
  0xc1   : > { %v507_v2 = vld [vmem:[%s2815_s5 + $0x1e8] sm:$0xff]  ;;  %v509_v3 = vld [vmem:[%s2815_s5 + $0x1f8] sm:$0xff]  ;;  %v506_v4 = vld [vmem:[%s2815_s5 + $0x1e0] sm:$0xff] }
  0xc2   : > { %531 = vmatprep.subr.mxu0 %v507_v2  ;;  %614 = vmatprep.subr.mxu1 %v509_v3  ;;  %v508_v5 = vld [vmem:[%s2815_s5 + $0x1f0] sm:$0xff]  ;;  %v503_v6 = vld [vmem:[%s2815_s5 + $0x1c8] sm:$0xff]  ;;  %v505_v7 = vld [vmem:[%s2815_s5 + $0x1d8] sm:$0xff] }
  0xc3   : > { %532 = vmatpush1.msra.mxu0 %v506_v4  ;;  %615 = vmatpush1.msra.mxu1 %v508_v5  ;;  %v502_v8 = vld [vmem:[%s2815_s5 + $0x1c0] sm:$0xff]  ;;  %v504_v9 = vld [vmem:[%s2815_s5 + $0x1d0] sm:$0xff]  ;;  %v499_v10 = vld [vmem:[%s2815_s5 + $0x1a8] sm:$0xff]  ;;  %v2496_v4 = vmov 0.0  }
  0xc4   : > { %533 = vmatprep.subr.mxu0 %v503_v6  ;;  %616 = vmatprep.subr.mxu1 %v505_v7  ;;  %v501_v11 = vld [vmem:[%s2815_s5 + $0x1b8] sm:$0xff]  ;;  %v498_v12 = vld [vmem:[%s2815_s5 + $0x1a0] sm:$0xff]  ;;  %v500_v13 = vld [vmem:[%s2815_s5 + $0x1b0] sm:$0xff]  ;;  %v511_v7 = vlaneseq }
  0xc5   : > { %534 = vmatpush1.msra.mxu0 %v502_v8  ;;  %617 = vmatpush1.msra.mxu1 %v504_v9  ;;  %v495_v14 = vld [vmem:[%s2815_s5 + $0x188] sm:$0xff]  ;;  %v497_v15 = vld [vmem:[%s2815_s5 + $0x198] sm:$0xff]  ;;  %v494_v16 = vld [vmem:[%s2815_s5 + $0x180] sm:$0xff] }
  0xc6   : > { %535 = vmatprep.subr.mxu0 %v499_v10  ;;  %618 = vmatprep.subr.mxu1 %v501_v11  ;;  %v496_v17 = vld [vmem:[%s2815_s5 + $0x190] sm:$0xff]  ;;  %v491_v18 = vld [vmem:[%s2815_s5 + $0x168] sm:$0xff]  ;;  %v493_v19 = vld [vmem:[%s2815_s5 + $0x178] sm:$0xff]  ;;  %v512_v8 = vshrl.u32 %v511_v7, 7 }
  0xc7   : > { %536 = vmatpush1.msra.mxu0 %v498_v12  ;;  %619 = vmatpush1.msra.mxu1 %v500_v13  ;;  %v490_v20 = vld [vmem:[%s2815_s5 + $0x160] sm:$0xff]  ;;  %v492_v21 = vld [vmem:[%s2815_s5 + $0x170] sm:$0xff]  ;;  %v487_v22 = vld [vmem:[%s2815_s5 + $0x148] sm:$0xff] }
  0xc8   : > { %537 = vmatprep.subr.mxu0 %v495_v14  ;;  %620 = vmatprep.subr.mxu1 %v497_v15  ;;  %v489_v23 = vld [vmem:[%s2815_s5 + $0x158] sm:$0xff]  ;;  %v486_v24 = vld [vmem:[%s2815_s5 + $0x140] sm:$0xff]  ;;  %v488_v25 = vld [vmem:[%s2815_s5 + $0x150] sm:$0xff]  ;;  %v513_v9 = vsub.s32 0, %v512_v8  ;;  %v521_v10 = vsub.s32 2, %v512_v8  ;;  %v517_v11 = vsub.s32 1, %v512_v8 }
  0xc9   : > { %538 = vmatpush1.msra.mxu0 %v494_v16  ;;  %621 = vmatpush1.msra.mxu1 %v496_v17  ;;  %v483_v26 = vld [vmem:[%s2815_s5 + $0x128] sm:$0xff]  ;;  %v485_v27 = vld [vmem:[%s2815_s5 + $0x138] sm:$0xff]  ;;  %v482_v28 = vld [vmem:[%s2815_s5 + $0x120] sm:$0xff]  ;;  %v525_v12 = vsub.s32 3, %v512_v8 }
  0xca   : > { %539 = vmatprep.subr.mxu0 %v491_v18  ;;  %622 = vmatprep.subr.mxu1 %v493_v19  ;;  %v484_v29 = vld [vmem:[%s2815_s5 + $0x130] sm:$0xff]  ;;  %v479_v30 = vld [vmem:[%s2815_s5 + $0x108] sm:$0xff]  ;;  %v481_v31 = vld [vmem:[%s2815_s5 + $0x118] sm:$0xff]  ;;  %v514_v13 = vrot.slane %v2838_v1, %v513_v9  ;;  %v522_v14 = vrot.slane %v2838_v1, %v521_v10  ;;  %v518_v15 = vrot.slane %v2838_v1, %v517_v11 }
  0xcb   : > { %540 = vmatpush1.msra.mxu0 %v490_v20  ;;  %623 = vmatpush1.msra.mxu1 %v492_v21  ;;  %v478_v32 = vld [vmem:[%s2815_s5 + $0x100] sm:$0xff]  ;;  %v480_v33 = vld [vmem:[%s2815_s5 + $0x110] sm:$0xff]  ;;  %v475_v34 = vld [vmem:[%s2815_s5 + $0xe8] sm:$0xff]  ;;  %v526_v16 = vrot.slane %v2838_v1, %v525_v12 }
  0xcc   : > { %541 = vmatprep.subr.mxu0 %v487_v22  ;;  %624 = vmatprep.subr.mxu1 %v489_v23  ;;  %v477_v35 = vld [vmem:[%s2815_s5 + $0xf8] sm:$0xff]  ;;  %v474_v36 = vld [vmem:[%s2815_s5 + $0xe0] sm:$0xff]  ;;  %v476_v37 = vld [vmem:[%s2815_s5 + $0xf0] sm:$0xff] }
  0xcd   : > { %542 = vmatpush1.msra.mxu0 %v486_v24  ;;  %625 = vmatpush1.msra.mxu1 %v488_v25  ;;  %v471_v38 = vld [vmem:[%s2815_s5 + $0xc8] sm:$0xff]  ;;  %v473_v39 = vld [vmem:[%s2815_s5 + $0xd8] sm:$0xff]  ;;  %v470_v40 = vld [vmem:[%s2815_s5 + $0xc0] sm:$0xff] }
  0xce   : > { %543 = vmatprep.subr.mxu0 %v483_v26  ;;  %626 = vmatprep.subr.mxu1 %v485_v27  ;;  %v472_v41 = vld [vmem:[%s2815_s5 + $0xd0] sm:$0xff]  ;;  %v467_v42 = vld [vmem:[%s2815_s5 + $0xa8] sm:$0xff]  ;;  %v469_v43 = vld [vmem:[%s2815_s5 + $0xb8] sm:$0xff] }
  0xcf   : > { %544 = vmatpush1.msra.mxu0 %v482_v28  ;;  %627 = vmatpush1.msra.mxu1 %v484_v29  ;;  %v466_v44 = vld [vmem:[%s2815_s5 + $0xa0] sm:$0xff]  ;;  %v468_v45 = vld [vmem:[%s2815_s5 + $0xb0] sm:$0xff]  ;;  %v463_v46 = vld [vmem:[%s2815_s5 + $0x88] sm:$0xff] }
  0xd0   : > { %545 = vmatprep.subr.mxu0 %v479_v30  ;;  %628 = vmatprep.subr.mxu1 %v481_v31  ;;  %v465_v47 = vld [vmem:[%s2815_s5 + $0x98] sm:$0xff]  ;;  %v462_v48 = vld [vmem:[%s2815_s5 + $0x80] sm:$0xff]  ;;  %v464_v49 = vld [vmem:[%s2815_s5 + $0x90] sm:$0xff] }
  0xd1   : > { %546 = vmatpush1.msra.mxu0 %v478_v32  ;;  %629 = vmatpush1.msra.mxu1 %v480_v33  ;;  %v459_v50 = vld [vmem:[%s2815_s5 + $0x68] sm:$0xff]  ;;  %v461_v51 = vld [vmem:[%s2815_s5 + $0x78] sm:$0xff]  ;;  %v458_v52 = vld [vmem:[%s2815_s5 + $0x60] sm:$0xff] }
  0xd2   : > { %547 = vmatprep.subr.mxu0 %v475_v34  ;;  %630 = vmatprep.subr.mxu1 %v477_v35  ;;  %v460_v53 = vld [vmem:[%s2815_s5 + $0x70] sm:$0xff]  ;;  %v455_v54 = vld [vmem:[%s2815_s5 + $0x48] sm:$0xff]  ;;  %v457_v55 = vld [vmem:[%s2815_s5 + $0x58] sm:$0xff] }
  0xd3   : > { %548 = vmatpush1.msra.mxu0 %v474_v36  ;;  %631 = vmatpush1.msra.mxu1 %v476_v37  ;;  %v454_v56 = vld [vmem:[%s2815_s5 + $0x40] sm:$0xff]  ;;  %v456_v57 = vld [vmem:[%s2815_s5 + $0x50] sm:$0xff]  ;;  %v451_v58 = vld [vmem:[%s2815_s5 + $0x28] sm:$0xff] }
  0xd4   : > { %549 = vmatprep.subr.mxu0 %v471_v38  ;;  %632 = vmatprep.subr.mxu1 %v473_v39  ;;  %v453_v59 = vld [vmem:[%s2815_s5 + $0x38] sm:$0xff]  ;;  %v450_v60 = vld [vmem:[%s2815_s5 + $0x20] sm:$0xff]  ;;  %v452_v61 = vld [vmem:[%s2815_s5 + $0x30] sm:$0xff] }
  0xd5   : > { %550 = vmatpush1.msra.mxu0 %v470_v40  ;;  %633 = vmatpush1.msra.mxu1 %v472_v41  ;;  %v447_v62 = vld [vmem:[%s2815_s5 + $0x8] sm:$0xff]  ;;  %v449_v63 = vld [vmem:[%s2815_s5 + $0x18] sm:$0xff]  ;;  %v446_v0 = vld [vmem:[%s2815_s5] sm:$0xff] }
  0xd6   : > { %551 = vmatprep.subr.mxu0 %v467_v42  ;;  %634 = vmatprep.subr.mxu1 %v469_v43  ;;  %v448_v2 = vld [vmem:[%s2815_s5 + $0x10] sm:$0xff]  ;;  %v445_v6 = vld [vmem:[%s2805_s28 + $0x10] sm:$0xff] }
  0xd7   : > { %552 = vmatpush1.msra.mxu0 %v466_v44  ;;  %635 = vmatpush1.msra.mxu1 %v468_v45  ;;  %v443_v3 = vld [vmem:[%s2805_s28] sm:$0xff]  ;;  %v444_v5 = vld [vmem:[%s2805_s28 + $0x8] sm:$0xff] }
  0xd8   : > { %553 = vmatprep.subr.mxu0 %v463_v46  ;;  %636 = vmatprep.subr.mxu1 %v465_v47 }
  0xd9   : > { %554 = vmatpush1.msra.mxu0 %v462_v48  ;;  %637 = vmatpush1.msra.mxu1 %v464_v49 }
  0xda   : > { %555 = vmatprep.subr.mxu0 %v459_v50  ;;  %638 = vmatprep.subr.mxu1 %v461_v51 }
  0xdb   : > { %556 = vmatpush1.msra.mxu0 %v458_v52  ;;  %639 = vmatpush1.msra.mxu1 %v460_v53 }
  0xdc   : > { %557 = vmatprep.subr.mxu0 %v455_v54  ;;  %640 = vmatprep.subr.mxu1 %v457_v55 }
  0xdd   : > { %558 = vmatpush1.msra.mxu0 %v454_v56  ;;  %641 = vmatpush1.msra.mxu1 %v456_v57 }
  0xde   : > { %559 = vmatprep.subr.mxu0 %v451_v58  ;;  %642 = vmatprep.subr.mxu1 %v453_v59 }
  0xdf   : > { %560 = vmatpush1.msra.mxu0 %v450_v60  ;;  %643 = vmatpush1.msra.mxu1 %v452_v61 }
  0xe0   : > { %561 = vmatprep.subr.mxu0 %v447_v62  ;;  %644 = vmatprep.subr.mxu1 %v449_v63 }
  0xe1   : > { %562 = vmatpush1.msra.mxu0 %v446_v0  ;;  %595 = vmatprep.mubr.f32.mxu0 %v2496_v4 }
  0xe2   : > { %645 = vmatpush1.msra.mxu1 %v448_v2  ;;  %678 = vmatprep.mubr.f32.mxu1 %v2496_v4 }
  0xe3   : > { %596 = vmatmul.mubr.f32.vlgmr.msra.gmra.mxu0 %v443_v3  ;;  %679 = vmatmul.mubr.f32.vlgmr.msra.gmra.mxu1 %v443_v3 }
  0xe4   : > { %601 = vmatprep.mubr.f32.mxu0 %v2496_v4  ;;  %684 = vmatprep.mubr.f32.mxu1 %v2496_v4 }
  0xe7   : > { %602 = vmatmul.mubr.f32.gmra.mxu0 %v444_v5  ;;  %685 = vmatmul.mubr.f32.gmra.mxu1 %v444_v5 }
  0xe8   : > { %607 = vmatprep.mubr.f32.mxu0 %v2496_v4  ;;  %690 = vmatprep.mubr.f32.mxu1 %v2496_v4 }
  0xeb   : > { %608 = vmatmul.mubr.f32.gmra.mxu0 %v445_v6  ;;  %691 = vmatmul.mubr.f32.gmra.mxu1 %v445_v6 }
 0x1a3   : > { %v597_v17 = vpop.f32.mrf.mxu0  ;;  %v680_v18 = vpop.f32.mrf.mxu1 }
 0x1a4   : > { %v598_v19 = vadd.f32 %v597_v17, %v514_v13  ;;  %v681_v20 = vadd.f32 %v680_v18, %v522_v14 }
 0x1a5   : > { %v599_v21 = vpop.f32.mrf.mxu0  ;;  %v682_v22 = vpop.f32.mrf.mxu1 }
 0x1a6   : > { %697 = vst [vmem:[#allocation3 + $0x30] sm:$0xff] %v598_v19  ;;  %699 = vst [vmem:[#allocation3 + $0x58] sm:$0xff] %v681_v20  ;;  %v600_v23 = vadd.f32 %v599_v21, %v518_v15  ;;  %v683_v24 = vadd.f32 %v682_v22, %v526_v16 }
 0x1a7   : > { %v603_v25 = vpop.f32.mrf.mxu0  ;;  %v686_v26 = vpop.f32.mrf.mxu1 }
 0x1a8   : > { %698 = vst [vmem:[#allocation3] sm:$0xff] %v600_v23  ;;  %700 = vst [vmem:[#allocation3 + $0x18] sm:$0xff] %v683_v24  ;;  %v604_v27 = vadd.f32 %v603_v25, %v514_v13  ;;  %v687_v28 = vadd.f32 %v686_v26, %v522_v14 }
 0x1a9   : > { %v605_v29 = vpop.f32.mrf.mxu0  ;;  %v688_v30 = vpop.f32.mrf.mxu1 }
 0x1aa   : > { %701 = vst [vmem:[#allocation3 + $0x50] sm:$0xff] %v604_v27  ;;  %703 = vst [vmem:[#allocation3 + $0x8] sm:$0xff] %v687_v28  ;;  %v606_v31 = vadd.f32 %v605_v29, %v518_v15  ;;  %v689_v32 = vadd.f32 %v688_v30, %v526_v16 }
 0x1ab   : > { %v609_v33 = vpop.f32.mrf.mxu0  ;;  %v692_v34 = vpop.f32.mrf.mxu1 }
 0x1ac   : > { %702 = vst [vmem:[#allocation3 + $0x20] sm:$0xff] %v606_v31  ;;  %704 = vst [vmem:[#allocation3 + $0x38] sm:$0xff] %v689_v32  ;;  %v610_v35 = vadd.f32 %v609_v33, %v514_v13  ;;  %v693_v36 = vadd.f32 %v692_v34, %v522_v14 }
 0x1ad   : > { %v611_v37 = vpop.f32.mrf.mxu0  ;;  %v694_v38 = vpop.f32.mrf.mxu1 }
 0x1ae   : > { %705 = vst [vmem:[#allocation3 + $0x28] sm:$0xff] %v610_v35  ;;  %707 = vst [vmem:[#allocation3 + $0x10] sm:$0xff] %v693_v36  ;;  %v612_v39 = vadd.f32 %v611_v37, %v518_v15  ;;  %v695_v40 = vadd.f32 %v694_v38, %v526_v16 }
 0x1b0   : > { %706 = vst [vmem:[#allocation3 + $0x48] sm:$0xff] %v612_v39  ;;  %708 = vst [vmem:[#allocation3 + $0x40] sm:$0xff] %v695_v40 }
 0x1b1 PF: > { %s3683_s28 = sld [smem:[#allocation27_spill]] }
 0x1b7   : > { %p1921_p8 = scmp.le.s32.totalorder %s3683_s28, 0 }
 0x1b8   : > { %s713_s1 = scalar_lea.vmem (!%p1921_p8), [#allocation2], %s431_s19 }
 0x1b9   : > { %712 = sbr.rel (%p1921_p8) target bundleno = 686 (0x2ae), region = 64 }
 0x1be   : > { %v778_v41 = vld [vmem:[%s2815_s5 + $0x1e8] sm:$0xff]  ;;  %v780_v42 = vld [vmem:[%s2815_s5 + $0x1f8] sm:$0xff]  ;;  %v777_v43 = vld [vmem:[%s2815_s5 + $0x1e0] sm:$0xff] }
 0x1bf   : > { %802 = vmatprep.subr.mxu0 %v778_v41  ;;  %885 = vmatprep.subr.mxu1 %v780_v42  ;;  %v779_v44 = vld [vmem:[%s2815_s5 + $0x1f0] sm:$0xff]  ;;  %v774_v45 = vld [vmem:[%s2815_s5 + $0x1c8] sm:$0xff]  ;;  %v776_v46 = vld [vmem:[%s2815_s5 + $0x1d8] sm:$0xff] }
 0x1c0   : > { %803 = vmatpush1.msra.mxu0 %v777_v43  ;;  %886 = vmatpush1.msra.mxu1 %v779_v44  ;;  %v773_v47 = vld [vmem:[%s2815_s5 + $0x1c0] sm:$0xff]  ;;  %v775_v48 = vld [vmem:[%s2815_s5 + $0x1d0] sm:$0xff]  ;;  %v770_v49 = vld [vmem:[%s2815_s5 + $0x1a8] sm:$0xff]  ;;  %v2497_v43 = vmov 0.0  }
 0x1c1   : > { %804 = vmatprep.subr.mxu0 %v774_v45  ;;  %887 = vmatprep.subr.mxu1 %v776_v46  ;;  %v772_v50 = vld [vmem:[%s2815_s5 + $0x1b8] sm:$0xff]  ;;  %v769_v51 = vld [vmem:[%s2815_s5 + $0x1a0] sm:$0xff]  ;;  %v771_v52 = vld [vmem:[%s2815_s5 + $0x1b0] sm:$0xff]  ;;  %v782_v46 = vlaneseq }
 0x1c2   : > { %805 = vmatpush1.msra.mxu0 %v773_v47  ;;  %888 = vmatpush1.msra.mxu1 %v775_v48  ;;  %v766_v53 = vld [vmem:[%s2815_s5 + $0x188] sm:$0xff]  ;;  %v768_v54 = vld [vmem:[%s2815_s5 + $0x198] sm:$0xff]  ;;  %v765_v55 = vld [vmem:[%s2815_s5 + $0x180] sm:$0xff] }
 0x1c3   : > { %806 = vmatprep.subr.mxu0 %v770_v49  ;;  %889 = vmatprep.subr.mxu1 %v772_v50  ;;  %v767_v56 = vld [vmem:[%s2815_s5 + $0x190] sm:$0xff]  ;;  %v762_v57 = vld [vmem:[%s2815_s5 + $0x168] sm:$0xff]  ;;  %v764_v58 = vld [vmem:[%s2815_s5 + $0x178] sm:$0xff]  ;;  %v783_v47 = vshrl.u32 %v782_v46, 7 }
 0x1c4   : > { %807 = vmatpush1.msra.mxu0 %v769_v51  ;;  %890 = vmatpush1.msra.mxu1 %v771_v52  ;;  %v761_v59 = vld [vmem:[%s2815_s5 + $0x160] sm:$0xff]  ;;  %v763_v60 = vld [vmem:[%s2815_s5 + $0x170] sm:$0xff]  ;;  %v758_v61 = vld [vmem:[%s2815_s5 + $0x148] sm:$0xff] }
 0x1c5   : > { %808 = vmatprep.subr.mxu0 %v766_v53  ;;  %891 = vmatprep.subr.mxu1 %v768_v54  ;;  %v760_v62 = vld [vmem:[%s2815_s5 + $0x158] sm:$0xff]  ;;  %v757_v63 = vld [vmem:[%s2815_s5 + $0x140] sm:$0xff]  ;;  %v759_v0 = vld [vmem:[%s2815_s5 + $0x150] sm:$0xff]  ;;  %v784_v48 = vsub.s32 0, %v783_v47  ;;  %v792_v49 = vsub.s32 2, %v783_v47  ;;  %v788_v50 = vsub.s32 1, %v783_v47 }
 0x1c6   : > { %809 = vmatpush1.msra.mxu0 %v765_v55  ;;  %892 = vmatpush1.msra.mxu1 %v767_v56  ;;  %v754_v2 = vld [vmem:[%s2815_s5 + $0x128] sm:$0xff]  ;;  %v756_v3 = vld [vmem:[%s2815_s5 + $0x138] sm:$0xff]  ;;  %v753_v4 = vld [vmem:[%s2815_s5 + $0x120] sm:$0xff]  ;;  %v796_v51 = vsub.s32 3, %v783_v47 }
 0x1c7   : > { %810 = vmatprep.subr.mxu0 %v762_v57  ;;  %893 = vmatprep.subr.mxu1 %v764_v58  ;;  %v755_v5 = vld [vmem:[%s2815_s5 + $0x130] sm:$0xff]  ;;  %v750_v6 = vld [vmem:[%s2815_s5 + $0x108] sm:$0xff]  ;;  %v752_v7 = vld [vmem:[%s2815_s5 + $0x118] sm:$0xff]  ;;  %v785_v52 = vrot.slane %v2838_v1, %v784_v48  ;;  %v793_v53 = vrot.slane %v2838_v1, %v792_v49  ;;  %v789_v54 = vrot.slane %v2838_v1, %v788_v50 }
 0x1c8   : > { %811 = vmatpush1.msra.mxu0 %v761_v59  ;;  %894 = vmatpush1.msra.mxu1 %v763_v60  ;;  %v749_v8 = vld [vmem:[%s2815_s5 + $0x100] sm:$0xff]  ;;  %v751_v9 = vld [vmem:[%s2815_s5 + $0x110] sm:$0xff]  ;;  %v746_v10 = vld [vmem:[%s2815_s5 + $0xe8] sm:$0xff]  ;;  %v797_v55 = vrot.slane %v2838_v1, %v796_v51 }
 0x1c9   : > { %812 = vmatprep.subr.mxu0 %v758_v61  ;;  %895 = vmatprep.subr.mxu1 %v760_v62  ;;  %v748_v11 = vld [vmem:[%s2815_s5 + $0xf8] sm:$0xff]  ;;  %v745_v12 = vld [vmem:[%s2815_s5 + $0xe0] sm:$0xff]  ;;  %v747_v13 = vld [vmem:[%s2815_s5 + $0xf0] sm:$0xff] }
 0x1ca   : > { %813 = vmatpush1.msra.mxu0 %v757_v63  ;;  %896 = vmatpush1.msra.mxu1 %v759_v0  ;;  %v742_v14 = vld [vmem:[%s2815_s5 + $0xc8] sm:$0xff]  ;;  %v744_v15 = vld [vmem:[%s2815_s5 + $0xd8] sm:$0xff]  ;;  %v741_v16 = vld [vmem:[%s2815_s5 + $0xc0] sm:$0xff] }
 0x1cb   : > { %814 = vmatprep.subr.mxu0 %v754_v2  ;;  %897 = vmatprep.subr.mxu1 %v756_v3  ;;  %v743_v17 = vld [vmem:[%s2815_s5 + $0xd0] sm:$0xff]  ;;  %v738_v18 = vld [vmem:[%s2815_s5 + $0xa8] sm:$0xff]  ;;  %v740_v19 = vld [vmem:[%s2815_s5 + $0xb8] sm:$0xff] }
 0x1cc   : > { %815 = vmatpush1.msra.mxu0 %v753_v4  ;;  %898 = vmatpush1.msra.mxu1 %v755_v5  ;;  %v737_v20 = vld [vmem:[%s2815_s5 + $0xa0] sm:$0xff]  ;;  %v739_v21 = vld [vmem:[%s2815_s5 + $0xb0] sm:$0xff]  ;;  %v734_v22 = vld [vmem:[%s2815_s5 + $0x88] sm:$0xff] }
 0x1cd   : > { %816 = vmatprep.subr.mxu0 %v750_v6  ;;  %899 = vmatprep.subr.mxu1 %v752_v7  ;;  %v736_v23 = vld [vmem:[%s2815_s5 + $0x98] sm:$0xff]  ;;  %v733_v24 = vld [vmem:[%s2815_s5 + $0x80] sm:$0xff]  ;;  %v735_v25 = vld [vmem:[%s2815_s5 + $0x90] sm:$0xff] }
 0x1ce   : > { %817 = vmatpush1.msra.mxu0 %v749_v8  ;;  %900 = vmatpush1.msra.mxu1 %v751_v9  ;;  %v730_v26 = vld [vmem:[%s2815_s5 + $0x68] sm:$0xff]  ;;  %v732_v27 = vld [vmem:[%s2815_s5 + $0x78] sm:$0xff]  ;;  %v729_v28 = vld [vmem:[%s2815_s5 + $0x60] sm:$0xff] }
 0x1cf   : > { %818 = vmatprep.subr.mxu0 %v746_v10  ;;  %901 = vmatprep.subr.mxu1 %v748_v11  ;;  %v731_v29 = vld [vmem:[%s2815_s5 + $0x70] sm:$0xff]  ;;  %v726_v30 = vld [vmem:[%s2815_s5 + $0x48] sm:$0xff]  ;;  %v728_v31 = vld [vmem:[%s2815_s5 + $0x58] sm:$0xff] }
 0x1d0   : > { %819 = vmatpush1.msra.mxu0 %v745_v12  ;;  %902 = vmatpush1.msra.mxu1 %v747_v13  ;;  %v725_v32 = vld [vmem:[%s2815_s5 + $0x40] sm:$0xff]  ;;  %v727_v33 = vld [vmem:[%s2815_s5 + $0x50] sm:$0xff]  ;;  %v722_v34 = vld [vmem:[%s2815_s5 + $0x28] sm:$0xff] }
 0x1d1   : > { %820 = vmatprep.subr.mxu0 %v742_v14  ;;  %903 = vmatprep.subr.mxu1 %v744_v15  ;;  %v724_v35 = vld [vmem:[%s2815_s5 + $0x38] sm:$0xff]  ;;  %v721_v36 = vld [vmem:[%s2815_s5 + $0x20] sm:$0xff]  ;;  %v723_v37 = vld [vmem:[%s2815_s5 + $0x30] sm:$0xff] }
 0x1d2   : > { %821 = vmatpush1.msra.mxu0 %v741_v16  ;;  %904 = vmatpush1.msra.mxu1 %v743_v17  ;;  %v718_v38 = vld [vmem:[%s2815_s5 + $0x8] sm:$0xff]  ;;  %v720_v39 = vld [vmem:[%s2815_s5 + $0x18] sm:$0xff]  ;;  %v717_v40 = vld [vmem:[%s2815_s5] sm:$0xff] }
 0x1d3   : > { %822 = vmatprep.subr.mxu0 %v738_v18  ;;  %905 = vmatprep.subr.mxu1 %v740_v19  ;;  %v719_v41 = vld [vmem:[%s2815_s5 + $0x10] sm:$0xff]  ;;  %v714_v42 = vld [vmem:[%s713_s1] sm:$0xff]  ;;  %v715_v44 = vld [vmem:[%s713_s1 + $0x8] sm:$0xff] }
 0x1d4   : > { %823 = vmatpush1.msra.mxu0 %v737_v20  ;;  %906 = vmatpush1.msra.mxu1 %v739_v21  ;;  %v716_v45 = vld [vmem:[%s713_s1 + $0x10] sm:$0xff] }
 0x1d5   : > { %824 = vmatprep.subr.mxu0 %v734_v22  ;;  %907 = vmatprep.subr.mxu1 %v736_v23 }
 0x1d6   : > { %825 = vmatpush1.msra.mxu0 %v733_v24  ;;  %908 = vmatpush1.msra.mxu1 %v735_v25 }
 0x1d7   : > { %826 = vmatprep.subr.mxu0 %v730_v26  ;;  %909 = vmatprep.subr.mxu1 %v732_v27 }
 0x1d8   : > { %827 = vmatpush1.msra.mxu0 %v729_v28  ;;  %910 = vmatpush1.msra.mxu1 %v731_v29 }
 0x1d9   : > { %828 = vmatprep.subr.mxu0 %v726_v30  ;;  %911 = vmatprep.subr.mxu1 %v728_v31 }
 0x1da   : > { %829 = vmatpush1.msra.mxu0 %v725_v32  ;;  %912 = vmatpush1.msra.mxu1 %v727_v33 }
 0x1db   : > { %830 = vmatprep.subr.mxu0 %v722_v34  ;;  %913 = vmatprep.subr.mxu1 %v724_v35 }
 0x1dc   : > { %831 = vmatpush1.msra.mxu0 %v721_v36  ;;  %914 = vmatpush1.msra.mxu1 %v723_v37 }
 0x1dd   : > { %832 = vmatprep.subr.mxu0 %v718_v38  ;;  %915 = vmatprep.subr.mxu1 %v720_v39 }
 0x1de   : > { %833 = vmatpush1.msra.mxu0 %v717_v40  ;;  %866 = vmatprep.mubr.f32.mxu0 %v2497_v43 }
 0x1df   : > { %916 = vmatpush1.msra.mxu1 %v719_v41  ;;  %949 = vmatprep.mubr.f32.mxu1 %v2497_v43 }
 0x1e0   : > { %867 = vmatmul.mubr.f32.vlgmr.msra.gmra.mxu0 %v714_v42  ;;  %950 = vmatmul.mubr.f32.vlgmr.msra.gmra.mxu1 %v714_v42 }
 0x1e1   : > { %872 = vmatprep.mubr.f32.mxu0 %v2497_v43  ;;  %955 = vmatprep.mubr.f32.mxu1 %v2497_v43 }
 0x1e4   : > { %873 = vmatmul.mubr.f32.gmra.mxu0 %v715_v44  ;;  %956 = vmatmul.mubr.f32.gmra.mxu1 %v715_v44 }
 0x1e5   : > { %878 = vmatprep.mubr.f32.mxu0 %v2497_v43  ;;  %961 = vmatprep.mubr.f32.mxu1 %v2497_v43 }
 0x1e8   : > { %879 = vmatmul.mubr.f32.gmra.mxu0 %v716_v45  ;;  %962 = vmatmul.mubr.f32.gmra.mxu1 %v716_v45 }
 0x2a0   : > { %v868_v56 = vpop.f32.mrf.mxu0  ;;  %v951_v57 = vpop.f32.mrf.mxu1 }
 0x2a1   : > { %v869_v58 = vadd.f32 %v868_v56, %v785_v52  ;;  %v952_v59 = vadd.f32 %v951_v57, %v793_v53 }
 0x2a2   : > { %v870_v60 = vpop.f32.mrf.mxu0  ;;  %v953_v61 = vpop.f32.mrf.mxu1 }
 0x2a3   : > { %968 = vst [vmem:[#allocation3 + $0x30] sm:$0xff] %v869_v58  ;;  %970 = vst [vmem:[#allocation3 + $0x58] sm:$0xff] %v952_v59  ;;  %v871_v62 = vadd.f32 %v870_v60, %v789_v54  ;;  %v954_v63 = vadd.f32 %v953_v61, %v797_v55 }
 0x2a4   : > { %v874_v0 = vpop.f32.mrf.mxu0  ;;  %v957_v2 = vpop.f32.mrf.mxu1 }
 0x2a5   : > { %969 = vst [vmem:[#allocation3] sm:$0xff] %v871_v62  ;;  %971 = vst [vmem:[#allocation3 + $0x18] sm:$0xff] %v954_v63  ;;  %v875_v3 = vadd.f32 %v874_v0, %v785_v52  ;;  %v958_v4 = vadd.f32 %v957_v2, %v793_v53 }
 0x2a6   : > { %v876_v5 = vpop.f32.mrf.mxu0  ;;  %v959_v6 = vpop.f32.mrf.mxu1 }
 0x2a7   : > { %972 = vst [vmem:[#allocation3 + $0x50] sm:$0xff] %v875_v3  ;;  %974 = vst [vmem:[#allocation3 + $0x8] sm:$0xff] %v958_v4  ;;  %v877_v1 = vadd.f32 %v876_v5, %v789_v54  ;;  %v960_v7 = vadd.f32 %v959_v6, %v797_v55 }
 0x2a8   : > { %v880_v8 = vpop.f32.mrf.mxu0  ;;  %v963_v9 = vpop.f32.mrf.mxu1 }
 0x2a9   : > { %973 = vst [vmem:[#allocation3 + $0x20] sm:$0xff] %v877_v1  ;;  %975 = vst [vmem:[#allocation3 + $0x38] sm:$0xff] %v960_v7  ;;  %v881_v10 = vadd.f32 %v880_v8, %v785_v52  ;;  %v964_v11 = vadd.f32 %v963_v9, %v793_v53 }
 0x2aa   : > { %v882_v12 = vpop.f32.mrf.mxu0  ;;  %v965_v13 = vpop.f32.mrf.mxu1 }
 0x2ab   : > { %976 = vst [vmem:[#allocation3 + $0x28] sm:$0xff] %v881_v10  ;;  %978 = vst [vmem:[#allocation3 + $0x10] sm:$0xff] %v964_v11  ;;  %v883_v14 = vadd.f32 %v882_v12, %v789_v54  ;;  %v966_v15 = vadd.f32 %v965_v13, %v797_v55 }
 0x2ad   : > { %977 = vst [vmem:[#allocation3 + $0x48] sm:$0xff] %v883_v14  ;;  %979 = vst [vmem:[#allocation3 + $0x40] sm:$0xff] %v966_v15 }
 0x2ae PF: > { %v2984_v16 = vld [vmem:[%s2821_s4 + $0x1e8] sm:$0xff]  ;;  %v2987_v17 = vld [vmem:[%s2821_s4 + $0x1e0] sm:$0xff]  ;;  %v3608_v20 = vmov 0.0   ;;  %v3015_v25 = vld [vmem:[%s2821_s4 + $0x1f8] sm:$0xff]  ;;  %s3248_s5 = scalar_lea.vmem [#allocation2], %s431_s19  ;;  %s3705_s8 = sld [smem:[#allocation27_spill]] }
 0x2af   : > { %v2990_v18 = vld [vmem:[%s2821_s4 + $0x1c8] sm:$0xff]  ;;  %1054 = vmatprep.subr.mxu0 %v2984_v16  ;;  %v2994_v19 = vld [vmem:[%s2821_s4 + $0x1c0] sm:$0xff]  ;;  %1118 = vmatprep.mubr.f32.mxu0 %v3608_v20  ;;  %v3023_v27 = vld [vmem:[%s2821_s4 + $0x1f0] sm:$0xff] }
 0x2b0   : > { %1055 = vmatpush1.msra.mxu0 %v2987_v17  ;;  %v2999_v21 = vld [vmem:[%s2821_s4 + $0x1a8] sm:$0xff]  ;;  %1189 = vmatprep.mubr.f32.mxu1 %v3608_v20  ;;  %v3004_v22 = vld [vmem:[%s2821_s4 + $0x1a0] sm:$0xff]  ;;  %v3031_v29 = vld [vmem:[%s2821_s4 + $0x1d8] sm:$0xff] }
 0x2b1   : > { %1056 = vmatprep.subr.mxu0 %v2990_v18  ;;  %v3008_v23 = vld [vmem:[%s2821_s4 + $0x188] sm:$0xff]  ;;  %v3012_v24 = vld [vmem:[%s2821_s4 + $0x180] sm:$0xff]  ;;  %1125 = vmatprep.subr.mxu1 %v3015_v25  ;;  %v3034_v30 = vld [vmem:[%s2821_s4 + $0x1d0] sm:$0xff] }
 0x2b2   : > { %1057 = vmatpush1.msra.mxu0 %v2994_v19  ;;  %v3019_v26 = vld [vmem:[%s2821_s4 + $0x168] sm:$0xff]  ;;  %v3027_v28 = vld [vmem:[%s2821_s4 + $0x160] sm:$0xff]  ;;  %1126 = vmatpush1.msra.mxu1 %v3023_v27  ;;  %v3042_v32 = vld [vmem:[%s2821_s4 + $0x1b8] sm:$0xff] }
 0x2b3   : > { %1058 = vmatprep.subr.mxu0 %v2999_v21  ;;  %v3038_v31 = vld [vmem:[%s2821_s4 + $0x148] sm:$0xff]  ;;  %1127 = vmatprep.subr.mxu1 %v3031_v29  ;;  %v3046_v33 = vld [vmem:[%s2821_s4 + $0x140] sm:$0xff]  ;;  %v3050_v34 = vld [vmem:[%s2821_s4 + $0x1b0] sm:$0xff] }
 0x2b4   : > { %1059 = vmatpush1.msra.mxu0 %v3004_v22  ;;  %1128 = vmatpush1.msra.mxu1 %v3034_v30  ;;  %v3053_v35 = vld [vmem:[%s2821_s4 + $0x198] sm:$0xff]  ;;  %v3057_v36 = vld [vmem:[%s2821_s4 + $0x128] sm:$0xff]  ;;  %v3061_v37 = vld [vmem:[%s2821_s4 + $0x190] sm:$0xff]  ;;  %p1925_p13 = scmp.ne.s32.totalorder %s3705_s8, 1 }
 0x2b5   : > { %1060 = vmatprep.subr.mxu0 %v3008_v23  ;;  %1129 = vmatprep.subr.mxu1 %v3042_v32  ;;  %v3065_v38 = vld [vmem:[%s2821_s4 + $0x120] sm:$0xff]  ;;  %v3069_v39 = vld [vmem:[%s2821_s4 + $0x178] sm:$0xff]  ;;  %v3073_v40 = vld [vmem:[%s2821_s4 + $0x108] sm:$0xff] }
 0x2b6   : > { %1061 = vmatpush1.msra.mxu0 %v3012_v24  ;;  %1130 = vmatpush1.msra.mxu1 %v3050_v34  ;;  %v3077_v41 = vld [vmem:[%s2821_s4 + $0x170] sm:$0xff]  ;;  %v3081_v42 = vld [vmem:[%s2821_s4 + $0x100] sm:$0xff]  ;;  %v3085_v43 = vld [vmem:[%s2821_s4 + $0x158] sm:$0xff] }
 0x2b7   : > { %1062 = vmatprep.subr.mxu0 %v3019_v26  ;;  %1131 = vmatprep.subr.mxu1 %v3053_v35  ;;  %v3089_v44 = vld [vmem:[%s2821_s4 + $0xe8] sm:$0xff]  ;;  %v3093_v45 = vld [vmem:[%s2821_s4 + $0x150] sm:$0xff]  ;;  %v3097_v46 = vld [vmem:[%s2821_s4 + $0xe0] sm:$0xff] }
 0x2b8   : > { %1063 = vmatpush1.msra.mxu0 %v3027_v28  ;;  %1132 = vmatpush1.msra.mxu1 %v3061_v37  ;;  %v3101_v47 = vld [vmem:[%s2821_s4 + $0x138] sm:$0xff]  ;;  %v3105_v48 = vld [vmem:[%s2821_s4 + $0xc8] sm:$0xff]  ;;  %v3109_v49 = vld [vmem:[%s2821_s4 + $0x130] sm:$0xff] }
 0x2b9   : > { %1064 = vmatprep.subr.mxu0 %v3038_v31  ;;  %1133 = vmatprep.subr.mxu1 %v3069_v39  ;;  %v3113_v50 = vld [vmem:[%s2821_s4 + $0xc0] sm:$0xff]  ;;  %v3117_v51 = vld [vmem:[%s2821_s4 + $0x118] sm:$0xff]  ;;  %v3121_v52 = vld [vmem:[%s2821_s4 + $0xa8] sm:$0xff] }
 0x2ba   : > { %1065 = vmatpush1.msra.mxu0 %v3046_v33  ;;  %1134 = vmatpush1.msra.mxu1 %v3077_v41  ;;  %v3125_v53 = vld [vmem:[%s2821_s4 + $0x110] sm:$0xff]  ;;  %v3129_v54 = vld [vmem:[%s2821_s4 + $0xa0] sm:$0xff]  ;;  %v3133_v55 = vld [vmem:[%s2821_s4 + $0xf8] sm:$0xff] }
 0x2bb   : > { %1066 = vmatprep.subr.mxu0 %v3057_v36  ;;  %1135 = vmatprep.subr.mxu1 %v3085_v43  ;;  %v3137_v56 = vld [vmem:[%s2821_s4 + $0x88] sm:$0xff]  ;;  %v3141_v57 = vld [vmem:[%s2821_s4 + $0xf0] sm:$0xff]  ;;  %v3145_v58 = vld [vmem:[%s2821_s4 + $0x80] sm:$0xff] }
 0x2bc   : > { %1067 = vmatpush1.msra.mxu0 %v3065_v38  ;;  %1136 = vmatpush1.msra.mxu1 %v3093_v45  ;;  %3685 = vst [vmem:[#allocation38_spill] sm:$0xff] %v3145_v58  ;;  %v3149_v59 = vld [vmem:[%s2821_s4 + $0xd8] sm:$0xff]  ;;  %v3153_v60 = vld [vmem:[%s2821_s4 + $0x68] sm:$0xff]  ;;  %v3157_v61 = vld [vmem:[%s2821_s4 + $0xd0] sm:$0xff] }
 0x2bd   : > { %1068 = vmatprep.subr.mxu0 %v3073_v40  ;;  %1137 = vmatprep.subr.mxu1 %v3101_v47  ;;  %3686 = vst [vmem:[#allocation39_spill] sm:$0xff] %v3153_v60  ;;  %v3161_v62 = vld [vmem:[%s2821_s4 + $0x60] sm:$0xff]  ;;  %v3165_v63 = vld [vmem:[%s2821_s4 + $0xb8] sm:$0xff]  ;;  %v3169_v0 = vld [vmem:[%s2821_s4 + $0x48] sm:$0xff] }
 0x2be   : > { %1069 = vmatpush1.msra.mxu0 %v3081_v42  ;;  %1138 = vmatpush1.msra.mxu1 %v3109_v49  ;;  %3687 = vst [vmem:[#allocation40_spill] sm:$0xff] %v3161_v62  ;;  %3688 = vst [vmem:[#allocation41_spill] sm:$0xff] %v3169_v0  ;;  %v3173_v2 = vld [vmem:[%s2821_s4 + $0xb0] sm:$0xff]  ;;  %v3177_v3 = vld [vmem:[%s2821_s4 + $0x40] sm:$0xff] }
 0x2bf   : > { %1070 = vmatprep.subr.mxu0 %v3089_v44  ;;  %1139 = vmatprep.subr.mxu1 %v3117_v51  ;;  %3689 = vst [vmem:[#allocation42_spill] sm:$0xff] %v3177_v3  ;;  %v3181_v4 = vld [vmem:[%s2821_s4 + $0x98] sm:$0xff]  ;;  %v3185_v5 = vld [vmem:[%s2821_s4 + $0x28] sm:$0xff]  ;;  %v3189_v6 = vld [vmem:[%s2821_s4 + $0x90] sm:$0xff] }
 0x2c0   : > { %1071 = vmatpush1.msra.mxu0 %v3097_v46  ;;  %1140 = vmatpush1.msra.mxu1 %v3125_v53  ;;  %3690 = vst [vmem:[#allocation43_spill] sm:$0xff] %v3181_v4  ;;  %3691 = vst [vmem:[#allocation44_spill] sm:$0xff] %v3185_v5  ;;  %v3193_v1 = vld [vmem:[%s2821_s4 + $0x20] sm:$0xff]  ;;  %v3197_v7 = vld [vmem:[%s2821_s4 + $0x78] sm:$0xff] }
 0x2c1   : > { %1072 = vmatprep.subr.mxu0 %v3105_v48  ;;  %1141 = vmatprep.subr.mxu1 %v3133_v55  ;;  %3692 = vst [vmem:[#allocation45_spill] sm:$0xff] %v3189_v6  ;;  %3693 = vst [vmem:[#allocation46_spill] sm:$0xff] %v3193_v1  ;;  %v3201_v8 = vld [vmem:[%s2821_s4 + $0x8] sm:$0xff]  ;;  %v3205_v9 = vld [vmem:[%s2821_s4 + $0x70] sm:$0xff] }
 0x2c2   : > { %1073 = vmatpush1.msra.mxu0 %v3113_v50  ;;  %1142 = vmatpush1.msra.mxu1 %v3141_v57  ;;  %3694 = vst [vmem:[#allocation47_spill] sm:$0xff] %v3197_v7  ;;  %3695 = vst [vmem:[#allocation48_spill] sm:$0xff] %v3201_v8  ;;  %v3209_v10 = vld [vmem:[%s2821_s4] sm:$0xff]  ;;  %v3213_v11 = vld [vmem:[%s2821_s4 + $0x58] sm:$0xff] }
 0x2c3   : > { %1074 = vmatprep.subr.mxu0 %v3121_v52  ;;  %1143 = vmatprep.subr.mxu1 %v3149_v59  ;;  %3696 = vst [vmem:[#allocation49_spill] sm:$0xff] %v3205_v9  ;;  %3697 = vst [vmem:[#allocation50_spill] sm:$0xff] %v3209_v10  ;;  %v1045_v12 = vld [vmem:[#allocation4] sm:$0xff]  ;;  %v3218_v13 = vld [vmem:[%s2821_s4 + $0x50] sm:$0xff] }
 0x2c4   : > { %1075 = vmatpush1.msra.mxu0 %v3129_v54  ;;  %1144 = vmatpush1.msra.mxu1 %v3157_v61  ;;  %3698 = vst [vmem:[#allocation51_spill] sm:$0xff] %v3213_v11  ;;  %3699 = vst [vmem:[#allocation52_spill] sm:$0xff] %v3218_v13  ;;  %v3223_v14 = vld [vmem:[%s2821_s4 + $0x38] sm:$0xff]  ;;  %v3228_v15 = vld [vmem:[%s2821_s4 + $0x30] sm:$0xff] }
 0x2c5   : > { %1076 = vmatprep.subr.mxu0 %v3137_v56  ;;  %1145 = vmatprep.subr.mxu1 %v3165_v63  ;;  %3700 = vst [vmem:[#allocation53_spill] sm:$0xff] %v3223_v14  ;;  %3701 = vst [vmem:[#allocation54_spill] sm:$0xff] %v3228_v15  ;;  %v3232_v20 = vld [vmem:[%s2821_s4 + $0x18] sm:$0xff] }
 0x2c6   : > { %1077 = vmatpush1.msra.mxu0 %v3145_v58  ;;  %1146 = vmatpush1.msra.mxu1 %v3173_v2  ;;  %3702 = vst [vmem:[#allocation55_spill] sm:$0xff] %v3232_v20 }
 0x2c7   : > { %1078 = vmatprep.subr.mxu0 %v3153_v60  ;;  %1147 = vmatprep.subr.mxu1 %v3181_v4 }
 0x2c8   : > { %1079 = vmatpush1.msra.mxu0 %v3161_v62  ;;  %1148 = vmatpush1.msra.mxu1 %v3189_v6  ;;  %v1052_v6 = vld [vmem:[#allocation3 + $0x58] sm:$0xff] }
 0x2c9   : > { %1080 = vmatprep.subr.mxu0 %v3169_v0  ;;  %1149 = vmatprep.subr.mxu1 %v3197_v7 }
 0x2ca   : > { %1081 = vmatpush1.msra.mxu0 %v3177_v3  ;;  %1150 = vmatpush1.msra.mxu1 %v3205_v9 }
 0x2cb   : > { %1082 = vmatprep.subr.mxu0 %v3185_v5  ;;  %1151 = vmatprep.subr.mxu1 %v3213_v11  ;;  %v1051_v5 = vld [vmem:[#allocation3] sm:$0xff] }
 0x2cc   : > { %1083 = vmatpush1.msra.mxu0 %v3193_v1  ;;  %1152 = vmatpush1.msra.mxu1 %v3218_v13  ;;  %v3236_v1 = vld [vmem:[%s2821_s4 + $0x10] sm:$0xff] }
 0x2cd   : > { %1084 = vmatprep.subr.mxu0 %v3201_v8  ;;  %1153 = vmatprep.subr.mxu1 %v3223_v14  ;;  %3703 = vst [vmem:[#allocation56_spill] sm:$0xff] %v3236_v1  ;;  %v1053_v14 = vld [vmem:[#allocation3 + $0x18] sm:$0xff] }
 0x2ce   : > { %1085 = vmatpush1.msra.mxu0 %v3209_v10  ;;  %1154 = vmatpush1.msra.mxu1 %v3228_v15  ;;  %v1050_v10 = vld [vmem:[#allocation3 + $0x30] sm:$0xff] }
 0x2cf   : > { %1119 = vmatmul.mubr.f32.vlgmr.msra.gmra.mxu0 %v1045_v12  ;;  %1155 = vmatprep.subr.mxu1 %v3232_v20 }
 0x2d0   : > { %1156 = vmatpush1.msra.mxu1 %v3236_v1 }
 0x2d1   : > { %1190 = vmatmul.mubr.f32.vlgmr.msra.gmra.mxu1 %v1045_v12 }
 0x38f   : > { %v1120_v8 = vpop.f32.mrf.mxu0 }
 0x390   : > { %v1196_v11 = vadd.f32 %v1120_v8, %v1050_v10  ;;  %v1046_v10 = vld [vmem:[#allocation5] sm:$0xff] }
 0x391   : > { %v1122_v3 = vpop.f32.mrf.mxu0  ;;  %v1191_v7 = vpop.f32.mrf.mxu1 }
 0x392   : > { %v1922_v9 = vmul.f32 -1.442695, %v1196_v11  ;;  %v1197_v13 = vadd.f32 %v1122_v3, %v1051_v5  ;;  %v1198_v60 = vadd.f32 %v1191_v7, %v1052_v6 }
 0x393   : > { %v1193_v62 = vpop.f32.mrf.mxu1 }
 0x394   : > { %2117 = vpow2.f32 %v1922_v9  ;;  %v1923_v0 = vmul.f32 -1.442695, %v1197_v13  ;;  %v1199_v15 = vadd.f32 %v1193_v62, %v1053_v14 }
 0x396   : > { %2119 = vpow2.f32 %v1923_v0  ;;  %v1924_v20 = vmul.f32 -1.442695, %v1199_v15 }
 0x397   : > { %2121 = vtanh.f32 %v1198_v60 }
 0x398   : > { %2123 = vpow2.f32 %v1924_v20 }
 0x3a1   : > { %v2118_v4 = vpop.eup %2117 }
 0x3a2   : > { %v1203_v1 = vadd.f32 1.0, %v2118_v4 }
 0x3a3   : > { %v2120_v12 = vpop.eup %2119 }
 0x3a4   : > { %2125 = vrcp.f32 %v1203_v1  ;;  %v1209_v8 = vadd.f32 1.0, %v2120_v12  ;;  %v2122_v3 = vpop.eup %2121 }
 0x3a5   : > { %v2124_v5 = vpop.eup %2123 }
 0x3a6   : > { %2127 = vrcp.f32 %v1209_v8  ;;  %v1216_v11 = vadd.f32 1.0, %v2124_v5 }
 0x3a8   : > { %2129 = vrcp.f32 %v1216_v11 }
 0x3b1   : > { %v2126_v9 = vpop.eup %2125 }
 0x3b2   : > { %v1220_v58 = vmul.f32 %v2126_v9, %v2122_v3 }
 0x3b3   : > { %v2128_v0 = vpop.eup %2127 }
 0x3b4   : > { %v1219_v13 = vmul.f32 %v2128_v0, %v1046_v10 }
 0x3b5   : > { %v2130_v60 = vpop.eup %2129 }
 0x3b6   : > { %v3241_v62 = vadd.f32 %v1220_v58, %v1219_v13 }
 0x3b8   : > { %2131 = vtanh.f32 %v3241_v62 }
 0x3c4   : > { %1229 = sbr.rel (%p1925_p13) target bundleno = 970 (0x3ca), region = 68 }
 0x3c5   : > { %v2132_v4 = vpop.eup %2131 }
 0x3c6   : > { %v3244_v20 = vmul.f32 %v2132_v4, %v2130_v60 }
 0x3c8   : > { %1226 = vst [vmem:[%s3248_s5] sm:$0xff] %v3244_v20 }
 0x3c9   : > { %1230 = vst [vmem:[%s2831_s24] sm:$0xff] %v3244_v20 }
 0x3ca PF: > { %s3706_s4 = sld [smem:[#allocation26_spill]] }
 0x3d0   : > { %s3258_s7 = smul.u32 3, %s3706_s4 }
 0x3d2   : > { %p1926_p7 = scmp.ne.s32.totalorder %s3258_s7, 7 }
 0x3d4   : > { %1235 = sbr.rel (%p1926_p7) target bundleno = 986 (0x3da), region = 72 }
 0x3d9   : > { %1236 = vst [vmem:[%s2833_s25] sm:$0xff] %v3244_v20  ;;  %1237 = vst [vmem:[%s2835_s27] sm:$0xff] %v3241_v62 }
 0x3da PF: > { %1245 = vmatprep.subr.mxu0 %v2984_v16  ;;  %1316 = vmatprep.subr.mxu1 %v3015_v25  ;;  %v3707_v58 = vmov 0.0   ;;  %v3708_v6 = vld [vmem:[#allocation38_spill] sm:$0xff]  ;;  %v3709_v1 = vld [vmem:[#allocation43_spill] sm:$0xff]  ;;  %v3711_v14 = vld [vmem:[#allocation45_spill] sm:$0xff] }
 0x3db   : > { %1246 = vmatpush1.msra.mxu0 %v2987_v17  ;;  %1317 = vmatpush1.msra.mxu1 %v3023_v27  ;;  %v3710_v7 = vld [vmem:[#allocation39_spill] sm:$0xff]  ;;  %v3712_v15 = vld [vmem:[#allocation40_spill] sm:$0xff]  ;;  %v3714_v8 = vld [vmem:[#allocation41_spill] sm:$0xff] }
 0x3dc   : > { %1247 = vmatprep.subr.mxu0 %v2990_v18  ;;  %1318 = vmatprep.subr.mxu1 %v3031_v29  ;;  %v3713_v12 = vld [vmem:[#allocation47_spill] sm:$0xff]  ;;  %v3715_v3 = vld [vmem:[#allocation49_spill] sm:$0xff]  ;;  %v3716_v5 = vld [vmem:[#allocation42_spill] sm:$0xff] }
 0x3dd   : > { %1248 = vmatpush1.msra.mxu0 %v2994_v19  ;;  %1319 = vmatpush1.msra.mxu1 %v3034_v30  ;;  %v3717_v9 = vld [vmem:[#allocation51_spill] sm:$0xff]  ;;  %v3718_v10 = vld [vmem:[#allocation44_spill] sm:$0xff]  ;;  %v3720_v11 = vld [vmem:[#allocation46_spill] sm:$0xff] }
 0x3de   : > { %1249 = vmatprep.subr.mxu0 %v2999_v21  ;;  %1320 = vmatprep.subr.mxu1 %v3042_v32  ;;  %v3719_v0 = vld [vmem:[#allocation52_spill] sm:$0xff]  ;;  %v3721_v13 = vld [vmem:[#allocation53_spill] sm:$0xff]  ;;  %v3723_v4 = vld [vmem:[#allocation54_spill] sm:$0xff] }
 0x3df   : > { %1250 = vmatpush1.msra.mxu0 %v3004_v22  ;;  %1321 = vmatpush1.msra.mxu1 %v3050_v34  ;;  %v3722_v60 = vld [vmem:[#allocation48_spill] sm:$0xff] }
 0x3e0   : > { %1251 = vmatprep.subr.mxu0 %v3008_v23  ;;  %1322 = vmatprep.subr.mxu1 %v3053_v35 }
 0x3e1   : > { %1252 = vmatpush1.msra.mxu0 %v3012_v24  ;;  %1323 = vmatpush1.msra.mxu1 %v3061_v37 }
 0x3e2   : > { %1253 = vmatprep.subr.mxu0 %v3019_v26  ;;  %1324 = vmatprep.subr.mxu1 %v3069_v39 }
 0x3e3   : > { %1254 = vmatpush1.msra.mxu0 %v3027_v28  ;;  %1325 = vmatpush1.msra.mxu1 %v3077_v41 }
 0x3e4   : > { %1255 = vmatprep.subr.mxu0 %v3038_v31  ;;  %1326 = vmatprep.subr.mxu1 %v3085_v43 }
 0x3e5   : > { %1256 = vmatpush1.msra.mxu0 %v3046_v33  ;;  %1327 = vmatpush1.msra.mxu1 %v3093_v45 }
 0x3e6   : > { %1257 = vmatprep.subr.mxu0 %v3057_v36  ;;  %1328 = vmatprep.subr.mxu1 %v3101_v47 }
 0x3e7   : > { %1258 = vmatpush1.msra.mxu0 %v3065_v38  ;;  %1329 = vmatpush1.msra.mxu1 %v3109_v49 }
 0x3e8   : > { %1259 = vmatprep.subr.mxu0 %v3073_v40  ;;  %1330 = vmatprep.subr.mxu1 %v3117_v51 }
 0x3e9   : > { %1260 = vmatpush1.msra.mxu0 %v3081_v42  ;;  %1309 = vmatprep.mubr.f32.mxu0 %v3707_v58 }
 0x3ea   : > { %1261 = vmatprep.subr.mxu0 %v3089_v44  ;;  %1331 = vmatpush1.msra.mxu1 %v3125_v53 }
 0x3eb   : > { %1262 = vmatpush1.msra.mxu0 %v3097_v46  ;;  %1332 = vmatprep.subr.mxu1 %v3133_v55 }
 0x3ec   : > { %1263 = vmatprep.subr.mxu0 %v3105_v48  ;;  %1333 = vmatpush1.msra.mxu1 %v3141_v57 }
 0x3ed   : > { %1264 = vmatpush1.msra.mxu0 %v3113_v50  ;;  %1334 = vmatprep.subr.mxu1 %v3149_v59 }
 0x3ee   : > { %1265 = vmatprep.subr.mxu0 %v3121_v52  ;;  %1335 = vmatpush1.msra.mxu1 %v3157_v61 }
 0x3ef   : > { %1266 = vmatpush1.msra.mxu0 %v3129_v54  ;;  %1336 = vmatprep.subr.mxu1 %v3165_v63 }
 0x3f0   : > { %1267 = vmatprep.subr.mxu0 %v3137_v56  ;;  %1337 = vmatpush1.msra.mxu1 %v3173_v2 }
 0x3f1   : > { %1268 = vmatpush1.msra.mxu0 %v3708_v6  ;;  %1338 = vmatprep.subr.mxu1 %v3709_v1  ;;  %v3724_v6 = vld [vmem:[#allocation50_spill] sm:$0xff]  ;;  %v3725_v1 = vld [vmem:[#allocation55_spill] sm:$0xff] }
 0x3f2   : > { %1269 = vmatprep.subr.mxu0 %v3710_v7  ;;  %1339 = vmatpush1.msra.mxu1 %v3711_v14  ;;  %v3726_v7 = vld [vmem:[#allocation56_spill] sm:$0xff]  ;;  %v1241_v14 = vld [vmem:[#allocation3 + $0x50] sm:$0xff] }
 0x3f3   : > { %1270 = vmatpush1.msra.mxu0 %v3712_v15  ;;  %1340 = vmatprep.subr.mxu1 %v3713_v12  ;;  %v1242_v12 = vld [vmem:[#allocation3 + $0x20] sm:$0xff] }
 0x3f4   : > { %1271 = vmatprep.subr.mxu0 %v3714_v8  ;;  %1341 = vmatpush1.msra.mxu1 %v3715_v3 }
 0x3f5   : > { %1272 = vmatpush1.msra.mxu0 %v3716_v5  ;;  %1342 = vmatprep.subr.mxu1 %v3717_v9 }
 0x3f6   : > { %1273 = vmatprep.subr.mxu0 %v3718_v10  ;;  %1343 = vmatpush1.msra.mxu1 %v3719_v0 }
 0x3f7   : > { %1274 = vmatpush1.msra.mxu0 %v3720_v11  ;;  %1344 = vmatprep.subr.mxu1 %v3721_v13  ;;  %v1244_v11 = vld [vmem:[#allocation3 + $0x38] sm:$0xff] }
 0x3f8   : > { %1275 = vmatprep.subr.mxu0 %v3722_v60  ;;  %1345 = vmatpush1.msra.mxu1 %v3723_v4  ;;  %v1243_v60 = vld [vmem:[#allocation3 + $0x8] sm:$0xff] }
 0x3f9   : > { %1276 = vmatpush1.msra.mxu0 %v3724_v6  ;;  %1346 = vmatprep.subr.mxu1 %v3725_v1 }
 0x3fa   : > { %1310 = vmatmul.mubr.f32.vlgmr.msra.gmra.mxu0 %v3244_v20  ;;  %1347 = vmatpush1.msra.mxu1 %v3726_v7 }
 0x3fb   : > { %1380 = vmatprep.mubr.f32.mxu1 %v3707_v58 }
 0x3fc   : > { %1381 = vmatmul.mubr.f32.vlgmr.msra.gmra.mxu1 %v3244_v20 }
 0x4ba   : > { %v1311_v15 = vpop.f32.mrf.mxu0 }
 0x4bb   : > { %v1387_v8 = vadd.f32 %v1311_v15, %v1241_v14 }
 0x4bc   : > { %v1313_v3 = vpop.f32.mrf.mxu0  ;;  %v1382_v0 = vpop.f32.mrf.mxu1 }
 0x4bd   : > { %v1927_v5 = vmul.f32 -1.442695, %v1387_v8  ;;  %v1388_v9 = vadd.f32 %v1313_v3, %v1242_v12  ;;  %v1389_v6 = vadd.f32 %v1382_v0, %v1243_v60 }
 0x4be   : > { %v1384_v13 = vpop.f32.mrf.mxu1 }
 0x4bf   : > { %2133 = vpow2.f32 %v1927_v5  ;;  %v1928_v10 = vmul.f32 -1.442695, %v1388_v9  ;;  %v1390_v4 = vadd.f32 %v1384_v13, %v1244_v11 }
 0x4c1   : > { %2135 = vpow2.f32 %v1928_v10  ;;  %v1929_v1 = vmul.f32 -1.442695, %v1390_v4 }
 0x4c2   : > { %2137 = vtanh.f32 %v1389_v6 }
 0x4c3   : > { %2139 = vpow2.f32 %v1929_v1 }
 0x4cc   : > { %v2134_v58 = vpop.eup %2133 }
 0x4cd   : > { %v1394_v7 = vadd.f32 1.0, %v2134_v58 }
 0x4ce   : > { %v2136_v20 = vpop.eup %2135 }
 0x4cf   : > { %2141 = vrcp.f32 %v1394_v7  ;;  %v1400_v14 = vadd.f32 1.0, %v2136_v20  ;;  %v2138_v15 = vpop.eup %2137 }
 0x4d0   : > { %v2140_v12 = vpop.eup %2139 }
 0x4d1   : > { %2143 = vrcp.f32 %v1400_v14  ;;  %v1407_v5 = vadd.f32 1.0, %v2140_v12 }
 0x4d3   : > { %2145 = vrcp.f32 %v1407_v5 }
 0x4dc   : > { %v2142_v8 = vpop.eup %2141 }
 0x4dd   : > { %v1411_v10 = vmul.f32 %v2142_v8, %v2138_v15 }
 0x4de   : > { %v2144_v3 = vpop.eup %2143 }
 0x4df   : > { %v1410_v9 = vmul.f32 %v2144_v3, %v3241_v62 }
 0x4e0   : > { %v2146_v0 = vpop.eup %2145 }
 0x4e1   : > { %v3334_v11 = vadd.f32 %v1411_v10, %v1410_v9 }
 0x4e3   : > { %2147 = vtanh.f32 %v3334_v11 }
 0x4ef   : > { %1420 = sbr.rel (%p1925_p13) target bundleno = 1269 (0x4f5), region = 76 }
 0x4f0   : > { %v2148_v13 = vpop.eup %2147 }
 0x4f1   : > { %v3337_v60 = vmul.f32 %v2148_v13, %v2146_v0 }
 0x4f3   : > { %1930 = vst [vmem:[%s3248_s5 + $0x8] sm:$0xff] %v3337_v60 }
 0x4f4   : > { %1932 = vst [vmem:[%s2831_s24 + $0x8] sm:$0xff] %v3337_v60 }
 0x4f5 PF: > { %s1423_s30 = sadd.s32 1, %s3258_s7 }
 0x4f6   : > { %p1933_p5 = scmp.ne.s32.totalorder %s1423_s30, 7 }
 0x4f8   : > { %1427 = sbr.rel (%p1933_p5) target bundleno = 1278 (0x4fe), region = 80 }
 0x4fd   : > { %1428 = vst [vmem:[%s2833_s25] sm:$0xff] %v3337_v60  ;;  %1429 = vst [vmem:[%s2835_s27] sm:$0xff] %v3334_v11 }
 0x4fe PF: > { %1437 = vmatprep.subr.mxu0 %v2984_v16  ;;  %1508 = vmatprep.subr.mxu1 %v3015_v25  ;;  %v3728_v16 = vmov 0.0   ;;  %v3736_v25 = vld [vmem:[#allocation49_spill] sm:$0xff] }
 0x4ff   : > { %1438 = vmatpush1.msra.mxu0 %v2987_v17  ;;  %1509 = vmatpush1.msra.mxu1 %v3023_v27  ;;  %v3729_v17 = vld [vmem:[#allocation38_spill] sm:$0xff]  ;;  %v3738_v27 = vld [vmem:[#allocation51_spill] sm:$0xff] }
 0x500   : > { %1439 = vmatprep.subr.mxu0 %v2990_v18  ;;  %1510 = vmatprep.subr.mxu1 %v3031_v29  ;;  %v3730_v18 = vld [vmem:[#allocation43_spill] sm:$0xff]  ;;  %v3740_v29 = vld [vmem:[#allocation52_spill] sm:$0xff] }
 0x501   : > { %1440 = vmatpush1.msra.mxu0 %v2994_v19  ;;  %1511 = vmatpush1.msra.mxu1 %v3034_v30  ;;  %v3731_v19 = vld [vmem:[#allocation39_spill] sm:$0xff]  ;;  %v3741_v30 = vld [vmem:[#allocation46_spill] sm:$0xff] }
 0x502   : > { %1441 = vmatprep.subr.mxu0 %v2999_v21  ;;  %1512 = vmatprep.subr.mxu1 %v3042_v32  ;;  %v3732_v21 = vld [vmem:[#allocation45_spill] sm:$0xff]  ;;  %v3743_v32 = vld [vmem:[#allocation48_spill] sm:$0xff] }
 0x503   : > { %1442 = vmatpush1.msra.mxu0 %v3004_v22  ;;  %1513 = vmatpush1.msra.mxu1 %v3050_v34  ;;  %v3733_v22 = vld [vmem:[#allocation40_spill] sm:$0xff]  ;;  %v3745_v34 = vld [vmem:[#allocation50_spill] sm:$0xff] }
 0x504   : > { %1443 = vmatprep.subr.mxu0 %v3008_v23  ;;  %1514 = vmatprep.subr.mxu1 %v3053_v35  ;;  %v3734_v23 = vld [vmem:[#allocation47_spill] sm:$0xff] }
 0x505   : > { %1444 = vmatpush1.msra.mxu0 %v3012_v24  ;;  %1515 = vmatpush1.msra.mxu1 %v3061_v37  ;;  %v3735_v24 = vld [vmem:[#allocation41_spill] sm:$0xff]  ;;  %v3746_v35 = vld [vmem:[#allocation55_spill] sm:$0xff]  ;;  %v1433_v37 = vld [vmem:[#allocation3 + $0x28] sm:$0xff] }
 0x506   : > { %1445 = vmatprep.subr.mxu0 %v3019_v26  ;;  %1516 = vmatprep.subr.mxu1 %v3069_v39  ;;  %v3737_v26 = vld [vmem:[#allocation42_spill] sm:$0xff]  ;;  %v1434_v39 = vld [vmem:[#allocation3 + $0x48] sm:$0xff] }
 0x507   : > { %1446 = vmatpush1.msra.mxu0 %v3027_v28  ;;  %1517 = vmatpush1.msra.mxu1 %v3077_v41  ;;  %v3739_v28 = vld [vmem:[#allocation44_spill] sm:$0xff] }
 0x508   : > { %1447 = vmatprep.subr.mxu0 %v3038_v31  ;;  %1518 = vmatprep.subr.mxu1 %v3085_v43  ;;  %v3742_v31 = vld [vmem:[#allocation53_spill] sm:$0xff] }
 0x509   : > { %1448 = vmatpush1.msra.mxu0 %v3046_v33  ;;  %1519 = vmatpush1.msra.mxu1 %v3093_v45  ;;  %v3744_v33 = vld [vmem:[#allocation54_spill] sm:$0xff] }
 0x50a   : > { %1449 = vmatprep.subr.mxu0 %v3057_v36  ;;  %1520 = vmatprep.subr.mxu1 %v3101_v47  ;;  %v3747_v36 = vld [vmem:[#allocation56_spill] sm:$0xff] }
 0x50b   : > { %1450 = vmatpush1.msra.mxu0 %v3065_v38  ;;  %1521 = vmatpush1.msra.mxu1 %v3109_v49 }
 0x50c   : > { %1451 = vmatprep.subr.mxu0 %v3073_v40  ;;  %1522 = vmatprep.subr.mxu1 %v3117_v51 }
 0x50d   : > { %1452 = vmatpush1.msra.mxu0 %v3081_v42  ;;  %1501 = vmatprep.mubr.f32.mxu0 %v3728_v16 }
 0x50e   : > { %1453 = vmatprep.subr.mxu0 %v3089_v44  ;;  %1523 = vmatpush1.msra.mxu1 %v3125_v53 }
 0x50f   : > { %1454 = vmatpush1.msra.mxu0 %v3097_v46  ;;  %1524 = vmatprep.subr.mxu1 %v3133_v55  ;;  %v1436_v46 = vld [vmem:[#allocation3 + $0x40] sm:$0xff] }
 0x510   : > { %1455 = vmatprep.subr.mxu0 %v3105_v48  ;;  %1525 = vmatpush1.msra.mxu1 %v3141_v57  ;;  %v1435_v48 = vld [vmem:[#allocation3 + $0x10] sm:$0xff] }
 0x511   : > { %1456 = vmatpush1.msra.mxu0 %v3113_v50  ;;  %1526 = vmatprep.subr.mxu1 %v3149_v59 }
 0x512   : > { %1457 = vmatprep.subr.mxu0 %v3121_v52  ;;  %1527 = vmatpush1.msra.mxu1 %v3157_v61 }
 0x513   : > { %1458 = vmatpush1.msra.mxu0 %v3129_v54  ;;  %1528 = vmatprep.subr.mxu1 %v3165_v63 }
 0x514   : > { %1459 = vmatprep.subr.mxu0 %v3137_v56  ;;  %1529 = vmatpush1.msra.mxu1 %v3173_v2 }
 0x515   : > { %1460 = vmatpush1.msra.mxu0 %v3729_v17  ;;  %1530 = vmatprep.subr.mxu1 %v3730_v18 }
 0x516   : > { %1461 = vmatprep.subr.mxu0 %v3731_v19  ;;  %1531 = vmatpush1.msra.mxu1 %v3732_v21 }
 0x517   : > { %1462 = vmatpush1.msra.mxu0 %v3733_v22  ;;  %1532 = vmatprep.subr.mxu1 %v3734_v23 }
 0x518   : > { %1463 = vmatprep.subr.mxu0 %v3735_v24  ;;  %1533 = vmatpush1.msra.mxu1 %v3736_v25 }
 0x519   : > { %1464 = vmatpush1.msra.mxu0 %v3737_v26  ;;  %1534 = vmatprep.subr.mxu1 %v3738_v27 }
 0x51a   : > { %1465 = vmatprep.subr.mxu0 %v3739_v28  ;;  %1535 = vmatpush1.msra.mxu1 %v3740_v29 }
 0x51b   : > { %1466 = vmatpush1.msra.mxu0 %v3741_v30  ;;  %1536 = vmatprep.subr.mxu1 %v3742_v31 }
 0x51c   : > { %1467 = vmatprep.subr.mxu0 %v3743_v32  ;;  %1537 = vmatpush1.msra.mxu1 %v3744_v33 }
 0x51d   : > { %1468 = vmatpush1.msra.mxu0 %v3745_v34  ;;  %1538 = vmatprep.subr.mxu1 %v3746_v35 }
 0x51e   : > { %1502 = vmatmul.mubr.f32.vlgmr.msra.gmra.mxu0 %v3337_v60  ;;  %1539 = vmatpush1.msra.mxu1 %v3747_v36 }
 0x51f   : > { %1572 = vmatprep.mubr.f32.mxu1 %v3728_v16 }
 0x520   : > { %1573 = vmatmul.mubr.f32.vlgmr.msra.gmra.mxu1 %v3337_v60 }
 0x5de   : > { %v1503_v38 = vpop.f32.mrf.mxu0 }
 0x5df   : > { %v1579_v40 = vadd.f32 %v1503_v38, %v1433_v37 }
 0x5e0   : > { %v1505_v41 = vpop.f32.mrf.mxu0  ;;  %v1574_v45 = vpop.f32.mrf.mxu1 }
 0x5e1   : > { %v1934_v42 = vmul.f32 -1.442695, %v1579_v40  ;;  %v1580_v43 = vadd.f32 %v1505_v41, %v1434_v39  ;;  %v1581_v50 = vadd.f32 %v1574_v45, %v1435_v48 }
 0x5e2   : > { %v1576_v47 = vpop.f32.mrf.mxu1 }
 0x5e3   : > { %2149 = vpow2.f32 %v1934_v42  ;;  %v1935_v44 = vmul.f32 -1.442695, %v1580_v43  ;;  %v1582_v49 = vadd.f32 %v1576_v47, %v1436_v46 }
 0x5e5   : > { %2151 = vpow2.f32 %v1935_v44  ;;  %v1936_v51 = vmul.f32 -1.442695, %v1582_v49 }
 0x5e6   : > { %2153 = vtanh.f32 %v1581_v50 }
 0x5e7   : > { %2155 = vpow2.f32 %v1936_v51 }
 0x5f0   : > { %v2150_v52 = vpop.eup %2149 }
 0x5f1   : > { %v1586_v53 = vadd.f32 1.0, %v2150_v52 }
 0x5f2   : > { %v2152_v54 = vpop.eup %2151 }
 0x5f3   : > { %2157 = vrcp.f32 %v1586_v53  ;;  %v1592_v55 = vadd.f32 1.0, %v2152_v54  ;;  %v2154_v56 = vpop.eup %2153 }
 0x5f4   : > { %v2156_v57 = vpop.eup %2155 }
 0x5f5   : > { %2159 = vrcp.f32 %v1592_v55  ;;  %v1599_v63 = vadd.f32 1.0, %v2156_v57 }
 0x5f7   : > { %2161 = vrcp.f32 %v1599_v63 }
 0x600   : > { %v2158_v59 = vpop.eup %2157 }
 0x601   : > { %v1603_v62 = vmul.f32 %v2158_v59, %v2154_v56 }
 0x602   : > { %v2160_v61 = vpop.eup %2159 }
 0x603   : > { %v1602_v2 = vmul.f32 %v2160_v61, %v3334_v11 }
 0x604   : > { %v2162_v6 = vpop.eup %2161 }
 0x605   : > { %v1604_v4 = vadd.f32 %v1603_v62, %v1602_v2 }
 0x607   : > { %2163 = vtanh.f32 %v1604_v4 }
 0x613   : > { %1612 = sbr.rel (%p1925_p13) target bundleno = 1561 (0x619), region = 84 }
 0x614   : > { %v2164_v1 = vpop.eup %2163 }
 0x615   : > { %v1606_v58 = vmul.f32 %v2164_v1, %v2162_v6 }
 0x617   : > { %1937 = vst [vmem:[%s3248_s5 + $0x10] sm:$0xff] %v1606_v58 }
 0x618   : > { %1939 = vst [vmem:[%s2831_s24 + $0x10] sm:$0xff] %v1606_v58 }
 0x619 PF: > { %s1615_s6 = sadd.s32 2, %s3258_s7 }
 0x61a   : > { %p1940_p0 = scmp.ne.s32.totalorder %s1615_s6, 7 }
 0x61c   : > { %1619 = sbr.rel (%p1940_p0) target bundleno = 1570 (0x622), region = 88 }
 0x621   : > { %1620 = vst [vmem:[%s2833_s25] sm:$0xff] %v1606_v58  ;;  %1621 = vst [vmem:[%s2835_s27] sm:$0xff] %v1604_v4 }
 0x622 PF: > { %s3749_s19 = sld [smem:[#allocation27_spill]]  ;;  %1622 = vst [vmem:[#allocation4] sm:$0xff] %v1606_v58  ;;  %1623 = vst [vmem:[#allocation5] sm:$0xff] %v1604_v4  ;;  %s1666_s8 = sshll.u32 %s2833_s25, 4  ;;  %s1667_s8 = int_to_ptr.vmem [resolvable:$true] %s1666_s8 }
 0x623   : > { %s3750_s15 = sld [smem:[#allocation29_spill]]  ;;  %s3435_s4 = scalar_lea.sflag [#allocation16], %s349_s14 }
 0x624   : > { %s3751_s12 = sld [smem:[#allocation62_spill]]  ;;  %s2277_s7 = scalar_lea.vmem %s1667_s8, 128 }
 0x625   : > { %p2278_p4 = scmp.ne.s32.totalorder %s1667_s8, %s2277_s7  ;;  %s2499_s29 = smov [#allocation15]  }
 0x626   : > { %s2281_s30 = sshll.u32 %s2499_s29, 4  ;;  %s2282_s30 = int_to_ptr.vmem [resolvable:$false] %s2281_s30 }
 0x627   : > { %s2283_s18 = scalar_lea.vmem %s2282_s30, 256  ;;  %p2284_p10 = scmp.lt.s32.totalorder %s1667_s8, %s2282_s30 }
 0x628   : > { %s1944_s28 = sshll.u32 %s3749_s19, 7  ;;  %p2285_p9 = scmp.lt.s32.totalorder %s2283_s18, %s2277_s7 }
 0x629   : > { %p3752_p6 = scmp.ne.s32.totalorder %s3750_s15, 0 }
 0x62a   : > { %s1664_s5 = scalar_lea.hbm %s3751_s12, %s1944_s28  ;;  %p2286_p11 = por %p2285_p9, %p2284_p10 }
 0x62b   : > { %p2279_p3 = pnand %p2278_p4, %p3752_p6 }
 0x62d   : > { %p2280_p2 = pneg %p2279_p3 }
 0x62f   : > { %p2287_p12 = pnand %p2286_p11, %p2280_p2 }
 0x631   : > { %2290 = shalt.err (!%p2287_p12)
}
 0x632   : > { %s2291_s6 = scalar_lea.hbm %s1664_s5, 128  ;;  %s2295_s25 = scalar_lea.hbm %s3751_s12, 256 }
 0x633   : > { %p2292_p8 = scmp.ne.s32.totalorder %s1664_s5, %s2291_s6  ;;  %p2296_p5 = scmp.lt.s32.totalorder %s1664_s5, %s3751_s12 }
 0x634   : > { %p2297_p0 = scmp.lt.s32.totalorder %s2295_s25, %s2291_s6 }
 0x635   : > { %p2293_p13 = pnand %p2292_p8, %p3752_p6 }
 0x636   : > { %p2298_p4 = por %p2297_p0, %p2296_p5 }
 0x637   : > { %p2294_p7 = pneg %p2293_p13 }
 0x639   : > { %p2299_p3 = pnand %p2298_p4, %p2294_p7 }
 0x63b   : > { %2302 = shalt.err (!%p2299_p3)
}
 0x63c   : > { %s3753_s7 = sld [smem:[#allocation26_spill]]  ;;  %p1642_p2 = scmp.eq.s32.totalorder %s3749_s19, 1 }
 0x63d   : > { %1965 = dma.vmem_to_hbm [thread:$0]  (%p3752_p6), %s1667_s8, 128, %s1664_s5, %s3435_s4  }
 0x63e   : > { %s1650_s29 = sshll.u32 %s2831_s24, 4  ;;  %s1679_s18 = sshll.u32 %s2835_s27, 4  ;;  %s3452_s29 = int_to_ptr.vmem [resolvable:$true] %s1650_s29  ;;  %s3463_s18 = int_to_ptr.vmem [resolvable:$true] %s1679_s18 }
 0x63f   : > { %s3754_s14 = sld [smem:[#allocation63_spill]]  ;;  %s3472_s0 = scalar_lea.sflag [#allocation8], %s408_s16 }
 0x640   : > { %s3755_s8 = sld [smem:[#allocation61_spill]]  ;;  %s2303_s3 = scalar_lea.vmem %s3452_s29, 384 }
 0x641   : > { %p2304_p10 = scmp.ne.s32.totalorder %s3452_s29, %s2303_s3  ;;  %s2500_s27 = smov [#allocation14]  }
 0x642   : > { %s3785_s7 = smov (!%p1642_p2, %s3753_s7), 0  ;;  %s2307_s19 = sshll.u32 %s2500_s27, 4  ;;  %s2308_s19 = int_to_ptr.vmem [resolvable:$false] %s2307_s19 }
 0x643   : > { %s1952_s30 = smul.u32 384, %s3785_s7  ;;  %p2305_p9 = pnand %p2304_p10, %p2747_p1 }
 0x644   : > { %p2310_p12 = scmp.lt.s32.totalorder %s3452_s29, %s2308_s19 }
 0x645   : > { %s3461_s25 = scalar_lea.hbm %s3754_s14, %s1944_s28  ;;  %p2306_p11 = pneg %p2305_p9 }
 0x646   : > { %s3756_s1 = smov %s3755_s8  ;;  %s3468_s24 = scalar_lea.hbm %s3755_s8, %s1952_s30 }
 0x647   : > { %s2309_s28 = scalar_lea.vmem %s2308_s19, 768 }
 0x648   : > { %p2311_p8 = scmp.lt.s32.totalorder %s2309_s28, %s2303_s3 }
 0x64a   : > { %p2312_p13 = por %p2311_p8, %p2310_p12 }
 0x64c   : > { %p2313_p7 = pnand %p2312_p13, %p2306_p11 }
 0x64e   : > { %2316 = shalt.err (!%p2313_p7)
}
 0x64f   : > { %s2317_s16 = scalar_lea.hbm %s3468_s24, 384  ;;  %s2321_s6 = scalar_lea.hbm %s3756_s1, 1152 }
 0x650   : > { %p2318_p5 = scmp.ne.s32.totalorder %s3468_s24, %s2317_s16  ;;  %p2322_p3 = scmp.lt.s32.totalorder %s3468_s24, %s3756_s1 }
 0x651   : > { %p2323_p2 = scmp.lt.s32.totalorder %s2321_s6, %s2317_s16 }
 0x652   : > { %p2319_p0 = pnand %p2318_p5, %p2747_p1 }
 0x653   : > { %p2324_p10 = por %p2323_p2, %p2322_p3 }
 0x654   : > { %p2320_p4 = pneg %p2319_p0 }
 0x656   : > { %p2325_p9 = pnand %p2324_p10, %p2320_p4 }
 0x658   : > { %2328 = shalt.err (!%p2325_p9)
}
 0x659   : > { %s2501_s3 = smov 128   ;;  %s2502_s5 = smov 8  }
 0x65a   : > { %1964 = dma.vmem_to_hbm [thread:$0]  (%p2747_p1), %s3452_s29, 384, %s3468_s24, %s3472_s0, %s2501_s3, %s2501_s3, %s2502_s5  }
 0x65b   : > { %s2329_s8 = scalar_lea.vmem %s3463_s18, 128  ;;  %s2503_s27 = smov [#allocation17]  }
 0x65c   : > { %p2330_p11 = scmp.ne.s32.totalorder %s3463_s18, %s2329_s8  ;;  %s2333_s19 = sshll.u32 %s2503_s27, 4  ;;  %s2334_s19 = int_to_ptr.vmem [resolvable:$false] %s2333_s19 }
 0x65d   : > { %s2335_s28 = scalar_lea.vmem %s2334_s19, 256  ;;  %p2336_p13 = scmp.lt.s32.totalorder %s3463_s18, %s2334_s19 }
 0x65e   : > { %p2331_p12 = pnand %p2330_p11, %p3752_p6  ;;  %p2337_p7 = scmp.lt.s32.totalorder %s2335_s28, %s2329_s8 }
 0x660   : > { %p2332_p8 = pneg %p2331_p12  ;;  %p2338_p5 = por %p2337_p7, %p2336_p13 }
 0x662   : > { %p2339_p0 = pnand %p2338_p5, %p2332_p8 }
 0x664   : > { %2342 = shalt.err (!%p2339_p0)
}
 0x665   : > { %s2343_s2 = scalar_lea.hbm %s3461_s25, 128  ;;  %s2347_s24 = scalar_lea.hbm %s3754_s14, 256 }
 0x666   : > { %p2344_p1 = scmp.ne.s32.totalorder %s3461_s25, %s2343_s2  ;;  %p2348_p2 = scmp.lt.s32.totalorder %s3461_s25, %s3754_s14 }
 0x667   : > { %p2349_p10 = scmp.lt.s32.totalorder %s2347_s24, %s2343_s2 }
 0x668   : > { %p2345_p4 = pnand %p2344_p1, %p3752_p6 }
 0x669   : > { %p2350_p9 = por %p2349_p10, %p2348_p2 }
 0x66a   : > { %p2346_p3 = pneg %p2345_p4 }
 0x66c   : > { %p2351_p11 = pnand %p2350_p9, %p2346_p3 }
 0x66e   : > { %2354 = shalt.err (!%p2351_p11)
}
 0x66f   : > { %1966 = dma.vmem_to_hbm [thread:$0]  (%p3752_p6), %s3463_s18, 128, %s3461_s25, %s3435_s4  }
 0x670 PF: > { %p1994_p12 = scmp.ge.s32.totalorder %s2485_s10, 2  ;;  %s1691_s30 = sand.u32 1, %s2433_s21  }
 0x671   : > { %p3757_p8 = scmp.ne.s32.totalorder %s3666_s17, 0  ;;  %s1692_s6 = scalar_lea.sflag [#allocation8], %s1691_s30 }
 0x673   : > { %p1984_p13 = pnand %p1994_p12, %p3757_p8 }
 0x675   : > { %p1985_p7 = pneg %p1984_p13 }
 0x677   : > { %2424 = dma.done.wait (%p1985_p7), %s1692_s6, 384  }
 0x678   : > { %2426 = vsyncadd (%p1985_p7), %s1692_s6, 4294966912  ;;  %s3758_s11 = sadd.s32 4294967294, %s2485_s10   ;;  %s3759_s13 = sld [smem:[#allocation30_spill]] }
 0x679   : > { %s1700_s15 = sand.u32 1, %s3758_s11  }
 0x67a   : > { %s1701_s4 = scalar_lea.sflag [#allocation16], %s1700_s15 }
 0x67e   : > { %p3760_p5 = scmp.ne.s32.totalorder %s3759_s13, 0 }
 0x680   : > { %p1987_p0 = pnand %p1994_p12, %p3760_p5 }
 0x682   : > { %p1988_p1 = pneg %p1987_p0 }
 0x684   : > { %2428 = dma.done.wait (%p1988_p1), %s1701_s4, 256  }
 0x685   : > { %2430 = vsyncadd (%p1988_p1), %s1701_s4, 4294967040  ;;  %s32_s10 = sadd.s32 1, %s2485_s10   ;;  %s3762_s24 = sld [smem:[#allocation23_spill]] }
 0x686   : > { %p3525_p6 = scmp.ge.s32.totalorder %s32_s10, 8   ;;  %s3763_s17 = sld [smem:[#allocation36_spill]] }
 0x687   : > { %s3764_s27 = sld [smem:[#allocation24_spill]]  ;;  %s3771_s21 = smov %s2437_s22 }
 0x688   : > { %s3765_s28 = sld [smem:[#allocation25_spill]]  ;;  %s3772_s22 = smov %s2441_s23 }
 0x689   : > { %s3766_s29 = sld [smem:[#allocation37_spill]]  ;;  %s3773_s23 = smov %s2759_s20 }
 0x68a   : > { %s3767_s30 = sld [smem:[#allocation28_spill]]  ;;  %s3774_s25 = smov %s2453_s26 }
 0x68b   : > { %s3768_s8 = sld [smem:[#allocation32_spill]]  ;;  %s3776_s7 = smov %s2481_s9 }
 0x68c   : > { %s3769_s18 = sld [smem:[#allocation33_spill]]  ;;  %s3775_s26 = smov %s3763_s17 }
 0x68e   :  { %31 = sbr.rel (!%p3525_p6) target bundleno = 24 (0x18), region = 195 }
 0x692   : > { %s3777_s9 = smov %s3769_s18 }
 0x693   :  { %1715 = vsyncpa [#allocation7], 1 }
 0x694   :  { %1717 = vsyncpa [#allocation7 + $0x1], 1 }
 0x695   :  { %1718 = vsyncpa [#allocation10], 1 }
 0x696   :  { %1720 = vsyncpa [#allocation10 + $0x1], 1 }
 0x697   :  { %1721 = vsyncpa [#allocation13], 1 }
 0x698   :  { %1723 = vsyncpa [#allocation13 + $0x1], 1 }
 0x699   :  { %1724 = vsyncpa [#allocation8], 1 }
 0x69a   :  { %1726 = vsyncpa [#allocation8 + $0x1], 1 }
 0x69b   :  { %1727 = vsyncpa [#allocation16], 1 }
 0x69c   :  { %1729 = vsyncpa [#allocation16 + $0x1], 1 }

</bundles_post_ra>
